<compile_context>
chip_gen: v6e
topology: v6e:2x2x1
jax: 0.10.0
libtpu: 0.0.40
codegen_flags: <defaults>
</compile_context>

<pallas_src>
import jax
import jax.numpy as jnp
from jax.experimental import pallas as pl
from jax.experimental.pallas import tpu as pltpu


COMPUTE_DTYPE = jnp.bfloat16            # MXU operand dtype
_VMEM_BUDGET_BYTES = 32 * 1024 * 1024   # sizing budget (fits default scoped limit)
_VMEM_LIMIT_BYTES = 48 * 1024 * 1024    # explicit scoped limit (headroom, < v7x 64MiB)


# ----------------------------------------------------------------------------
# static tiling helpers
# ----------------------------------------------------------------------------
def _round_up(x, m):
    return ((x + m - 1) // m) * m


def _pick_row_tile(n_rows, bytes_per_row, budget=2 << 20, cap_rows=512):
    """MXU-aligned row tile sized by byte budget; callers pad rows up to it."""
    rt = min(cap_rows, max(8, budget // max(bytes_per_row, 1)))
    align = 128 if (rt >= 128 and n_rows >= 128) else 8
    rt = max(align, (rt // align) * align)
    rt = min(rt, _round_up(n_rows, align))
    return max(8, rt)


def _pick_col_tile(g, f_rows, max_bytes=4 << 20, elem_bytes=2):
    """Largest multiple of 128 dividing g whose (f_rows, tg) bf16 block fits."""
    if g % 128 != 0:
        return g
    best = 128
    tg = 128
    while tg <= g:
        if g % tg == 0 and f_rows * tg * elem_bytes <= max_bytes:
            best = tg
        tg += 128
    return best


def _pick_time_chunk(T, B, H, budget_bytes=_VMEM_BUDGET_BYTES, cap=64):
    """VMEM-budget-aware time chunk for the fused bidirectional recurrence."""
    # double-buffered: 2 gate in-blocks (tc,B,4H) f32 + 2 out blocks (tc,B,H) bf16
    per_step = 2 * 2 * (B * 4 * H * 4) + 2 * 2 * (B * H * 2)
    # resident: block-diag whh (2H,8H) bf16 (x2 buffers) + 4 (B,H) f32 scratch
    fixed = 2 * (2 * H) * (8 * H) * 2 + 4 * (B * H * 4)
    avail = max(budget_bytes - fixed, per_step)
    cap = max(1, min(cap, avail // per_step))
    best = 1
    for d in range(1, min(T, cap) + 1):
        if T % d == 0:
            best = d
    return best


def _pad_rows(x, rt):
    n = x.shape[0]
    n_pad = _round_up(n, rt)
    if n_pad != n:
        x = jnp.pad(x, ((0, n_pad - n), (0, 0)))
    return x, n


# ----------------------------------------------------------------------------
# Kernel 1: hoisted input projection (both directions): (N,F)@(F,8H) + bias
# ----------------------------------------------------------------------------
def _matmul_bias_kernel(x_ref, w_ref, b_ref, o_ref):
    o_ref[...] = (jnp.dot(x_ref[...], w_ref[...],
                          preferred_element_type=jnp.float32) + b_ref[...])


def input_projection(x2d, w, b2d):
    """x2d: (N,F) bf16, w: (F,8H) bf16, b2d: (1,8H) f32 -> (N,8H) f32."""
    n, f = x2d.shape
    g = w.shape[1]
    rt = _pick_row_tile(n, (f + g) * 4)
    tg = _pick_col_tile(g, f)
    xp, n_orig = _pad_rows(x2d, rt)
    n_pad = xp.shape[0]
    out = pl.pallas_call(
        _matmul_bias_kernel,
        out_shape=jax.ShapeDtypeStruct((n_pad, g), jnp.float32),
        grid_spec=pltpu.PrefetchScalarGridSpec(
            num_scalar_prefetch=0,
            grid=(n_pad // rt, g // tg),
            in_specs=[pl.BlockSpec((rt, f), lambda r, c: (r, 0)),
                      pl.BlockSpec((f, tg), lambda r, c: (0, c)),
                      pl.BlockSpec((1, tg), lambda r, c: (0, c))],
            out_specs=pl.BlockSpec((rt, tg), lambda r, c: (r, c)),
        ),
        compiler_params=pltpu.CompilerParams(
            dimension_semantics=("parallel", "parallel"),
            vmem_limit_bytes=_VMEM_LIMIT_BYTES),
    )(xp, w, b2d)
    return out[:n_orig] if n_pad != n_orig else out


# ----------------------------------------------------------------------------
# Kernel 2: dual-operand projection (avoids materializing concat(h_fwd,h_bwd))
#           gx = h_fwd @ W_top + h_bwd @ W_bot + bias          (layers > 0)
# Kernel 3: same + residual add                                 (final FC)
# ----------------------------------------------------------------------------
def _dual_matmul_bias_kernel(a_ref, b_ref, wa_ref, wb_ref, bias_ref, o_ref):
    o_ref[...] = (
        jnp.dot(a_ref[...], wa_ref[...], preferred_element_type=jnp.float32)
        + jnp.dot(b_ref[...], wb_ref[...], preferred_element_type=jnp.float32)
        + bias_ref[...])


def _dual_matmul_bias_res_kernel(a_ref, b_ref, wa_ref, wb_ref, bias_ref,
                                 res_ref, o_ref):
    o_ref[...] = (
        jnp.dot(a_ref[...], wa_ref[...], preferred_element_type=jnp.float32)
        + jnp.dot(b_ref[...], wb_ref[...], preferred_element_type=jnp.float32)
        + bias_ref[...] + res_ref[...])


def hidden_projection(hf2d, hb2d, w_top, w_bot, b2d):
    """hf2d/hb2d: (N,H) bf16; w_top/w_bot: (H,8H) bf16; b2d: (1,8H) f32."""
    n, h = hf2d.shape
    g = w_top.shape[1]
    rt = _pick_row_tile(n, (2 * h + g) * 4)
    tg = _pick_col_tile(g, h)
    hfp, n_orig = _pad_rows(hf2d, rt)
    hbp, _ = _pad_rows(hb2d, rt)
    n_pad = hfp.shape[0]
    out = pl.pallas_call(
        _dual_matmul_bias_kernel,
        out_shape=jax.ShapeDtypeStruct((n_pad, g), jnp.float32),
        grid_spec=pltpu.PrefetchScalarGridSpec(
            num_scalar_prefetch=0,
            grid=(n_pad // rt, g // tg),
            in_specs=[pl.BlockSpec((rt, h), lambda r, c: (r, 0)),
                      pl.BlockSpec((rt, h), lambda r, c: (r, 0)),
                      pl.BlockSpec((h, tg), lambda r, c: (0, c)),
                      pl.BlockSpec((h, tg), lambda r, c: (0, c)),
                      pl.BlockSpec((1, tg), lambda r, c: (0, c))],
            out_specs=pl.BlockSpec((rt, tg), lambda r, c: (r, c)),
        ),
        compiler_params=pltpu.CompilerParams(
            dimension_semantics=("parallel", "parallel"),
            vmem_limit_bytes=_VMEM_LIMIT_BYTES),
    )(hfp, hbp, w_top, w_bot, b2d)
    return out[:n_orig] if n_pad != n_orig else out


def fc_residual(hf2d, hb2d, w_top, w_bot, b2d, x2d):
    """out = hf @ W_fc[:,:H]^T + hb @ W_fc[:,H:]^T + b + x  -> (N,O) f32."""
    n, h = hf2d.shape
    o = w_top.shape[1]
    rt = _pick_row_tile(n, (2 * h + 2 * o) * 4)
    hfp, n_orig = _pad_rows(hf2d, rt)
    hbp, _ = _pad_rows(hb2d, rt)
    xp, _ = _pad_rows(x2d, rt)
    n_pad = hfp.shape[0]
    out = pl.pallas_call(
        _dual_matmul_bias_res_kernel,
        out_shape=jax.ShapeDtypeStruct((n_pad, o), jnp.float32),
        grid_spec=pltpu.PrefetchScalarGridSpec(
            num_scalar_prefetch=0,
            grid=(n_pad // rt,),
            in_specs=[pl.BlockSpec((rt, h), lambda r: (r, 0)),
                      pl.BlockSpec((rt, h), lambda r: (r, 0)),
                      pl.BlockSpec((h, o), lambda r: (0, 0)),
                      pl.BlockSpec((h, o), lambda r: (0, 0)),
                      pl.BlockSpec((1, o), lambda r: (0, 0)),
                      pl.BlockSpec((rt, o), lambda r: (r, 0))],
            out_specs=pl.BlockSpec((rt, o), lambda r: (r, 0)),
        ),
        compiler_params=pltpu.CompilerParams(
            dimension_semantics=("parallel",),
            vmem_limit_bytes=_VMEM_LIMIT_BYTES),
    )(hfp, hbp, w_top, w_bot, b2d, xp)
    return out[:n_orig] if n_pad != n_orig else out


# ----------------------------------------------------------------------------
# Kernel 4: fused bidirectional recurrence.
#   Grid step k owns time chunk [k*Tc,(k+1)*Tc) forward and the mirrored chunk
#   (consumed back-to-front) backward; time reversal is purely index_maps.
#   The two per-step hidden matmuls are fused into one MXU push via a
#   block-diagonal (2H, 8H) weight.  Only that matmul sits on the serial path.
# ----------------------------------------------------------------------------
def _bilstm_kernel(gxf_ref, gxb_ref, whh_ref, hf_out_ref, hb_out_ref,
                   hf_scr, cf_scr, hb_scr, cb_scr):
    k = pl.program_id(0)

    @pl.when(k == 0)
    def _init():
        hf_scr[...] = jnp.zeros_like(hf_scr)
        cf_scr[...] = jnp.zeros_like(cf_scr)
        hb_scr[...] = jnp.zeros_like(hb_scr)
        cb_scr[...] = jnp.zeros_like(cb_scr)

    tc = gxf_ref.shape[0]
    H = hf_scr.shape[1]

    whh = whh_ref[...]                    # (2H, 8H) bf16, resident across chunk
    hf, cf = hf_scr[...], cf_scr[...]     # f32 carries live in vregs in-chunk
    hb, cb = hb_scr[...], cb_scr[...]

    def sigmoid(x):
        # exp + approx reciprocal: both on the EUP slot, off the VPU.
        return pl.reciprocal(1.0 + jnp.exp(-x), approx=True)

    def cell(gates, c_prev):              # PyTorch gate order [i, f, g, o]
        i_g = sigmoid(gates[:, 0 * H:1 * H])
        f_g = sigmoid(gates[:, 1 * H:2 * H])
        g_g = jnp.tanh(gates[:, 2 * H:3 * H])
        o_g = sigmoid(gates[:, 3 * H:4 * H])
        c_new = f_g * c_prev + i_g * g_g
        return o_g * jnp.tanh(c_new), c_new

    for s in range(tc):
        sb = tc - 1 - s
        hcat = jnp.concatenate([hf, hb], axis=-1).astype(whh.dtype)    # (B,2H)
        ghh = jnp.dot(hcat, whh, preferred_element_type=jnp.float32)   # (B,8H)
        g_f = gxf_ref[s] + ghh[:, :4 * H]
        g_b = gxb_ref[sb] + ghh[:, 4 * H:]
        hf, cf = cell(g_f, cf)
        hb, cb = cell(g_b, cb)
        hf_out_ref[s] = hf.astype(hf_out_ref.dtype)
        hb_out_ref[sb] = hb.astype(hb_out_ref.dtype)

    hf_scr[...] = hf
    cf_scr[...] = cf
    hb_scr[...] = hb
    cb_scr[...] = cb


def bilstm_layer(gates, whh_blk, time_chunk):
    """gates: (T,B,8H) f32 time-major; cols [:4H] fwd, [4H:] bwd (each already
    x@W_ih^T + b_ih + b_hh).  whh_blk: (2H,8H) bf16 block-diag of the two
    transposed hidden weights.  Returns (h_fwd, h_bwd) bf16, each (T,B,H)."""
    T, B, G = gates.shape
    H = G // 8
    tc = time_chunk
    n_chunks = T // tc

    if (4 * H) % 128 == 0:
        g_f_arr, g_b_arr, bwd_col = gates, gates, 1          # no HBM split needed
    else:
        g_f_arr, g_b_arr, bwd_col = gates[..., :4 * H], gates[..., 4 * H:], 0

    gate_f_spec = pl.BlockSpec((tc, B, 4 * H), lambda k: (k, 0, 0))
    gate_b_spec = pl.BlockSpec((tc, B, 4 * H),
                               lambda k: (n_chunks - 1 - k, 0, bwd_col))
    whh_spec = pl.BlockSpec((2 * H, 8 * H), lambda k: (0, 0))
    out_f_spec = pl.BlockSpec((tc, B, H), lambda k: (k, 0, 0))
    out_b_spec = pl.BlockSpec((tc, B, H), lambda k: (n_chunks - 1 - k, 0, 0))

    return pl.pallas_call(
        _bilstm_kernel,
        out_shape=(jax.ShapeDtypeStruct((T, B, H), COMPUTE_DTYPE),
                   jax.ShapeDtypeStruct((T, B, H), COMPUTE_DTYPE)),
        grid_spec=pltpu.PrefetchScalarGridSpec(
            num_scalar_prefetch=0,
            grid=(n_chunks,),
            in_specs=[gate_f_spec, gate_b_spec, whh_spec],
            out_specs=[out_f_spec, out_b_spec],
            scratch_shapes=[pltpu.VMEM((B, H), jnp.float32)] * 4,
        ),
        compiler_params=pltpu.CompilerParams(
            dimension_semantics=("arbitrary",),        # sequential recurrence
            vmem_limit_bytes=_VMEM_LIMIT_BYTES),
    )(g_f_arr, g_b_arr, whh_blk)


# ----------------------------------------------------------------------------
# Parameter init (PyTorch-style uniform(-1/sqrt(H),1/sqrt(H)), PyTorch layout)
# ----------------------------------------------------------------------------
def init_blstm_params(key, input_size, hidden_size, num_layers, output_size):
    stdv = 1.0 / jnp.sqrt(jnp.float32(hidden_size))

    def u(k, shape, bound):
        return jax.random.uniform(k, shape, jnp.float32, -bound, bound)

    params = {"layers": []}
    for layer in range(num_layers):
        f_in = input_size if layer == 0 else 2 * hidden_size
        layer_p = {}
        for direction in ("fwd", "bwd"):
            key, k1, k2, k3, k4 = jax.random.split(key, 5)
            layer_p[direction] = {
                "w_ih": u(k1, (4 * hidden_size, f_in), stdv),
                "w_hh": u(k2, (4 * hidden_size, hidden_size), stdv),
                "bias": (u(k3, (4 * hidden_size,), stdv)
                         + u(k4, (4 * hidden_size,), stdv)),   # b_ih + b_hh
            }
        params["layers"].append(layer_p)

    key, k1, k2 = jax.random.split(key, 3)
    fc_bound = 1.0 / jnp.sqrt(jnp.float32(2 * hidden_size))
    params["fc_w"] = u(k1, (output_size, 2 * hidden_size), fc_bound)
    params["fc_b"] = u(k2, (output_size,), fc_bound)
    return params


# ----------------------------------------------------------------------------
# One-time weight packing (transposes / concats / block-diag / bf16 casts).
# ----------------------------------------------------------------------------
def pack_blstm_params(params):
    layers = params["layers"]
    H = layers[0]["fwd"]["w_hh"].shape[1]
    packed = {"layers": []}
    for layer, p in enumerate(layers):
        lw = {"bias8": jnp.concatenate([p["fwd"]["bias"], p["bwd"]["bias"]])
                          .reshape(1, 8 * H).astype(jnp.float32)}
        if layer == 0:
            lw["w_in"] = jnp.concatenate(
                [p["fwd"]["w_ih"].T, p["bwd"]["w_ih"].T],
                axis=1).astype(COMPUTE_DTYPE)                       # (F, 8H)
        else:
            # concat(h_fwd,h_bwd) @ W_ih^T == h_fwd @ W_top + h_bwd @ W_bot
            lw["w_top"] = jnp.concatenate(
                [p["fwd"]["w_ih"][:, :H].T, p["bwd"]["w_ih"][:, :H].T],
                axis=1).astype(COMPUTE_DTYPE)                       # (H, 8H)
            lw["w_bot"] = jnp.concatenate(
                [p["fwd"]["w_ih"][:, H:].T, p["bwd"]["w_ih"][:, H:].T],
                axis=1).astype(COMPUTE_DTYPE)
        whh_blk = jnp.zeros((2 * H, 8 * H), jnp.float32)
        whh_blk = whh_blk.at[:H, :4 * H].set(p["fwd"]["w_hh"].T)
        whh_blk = whh_blk.at[H:, 4 * H:].set(p["bwd"]["w_hh"].T)
        lw["whh_blk"] = whh_blk.astype(COMPUTE_DTYPE)               # (2H, 8H)
        packed["layers"].append(lw)
    w_fc = params["fc_w"]                                           # (O, 2H)
    packed["fc_w_top"] = w_fc[:, :H].T.astype(COMPUTE_DTYPE)        # (H, O)
    packed["fc_w_bot"] = w_fc[:, H:].T.astype(COMPUTE_DTYPE)
    packed["fc_b"] = params["fc_b"].reshape(1, -1).astype(jnp.float32)
    return packed


# ----------------------------------------------------------------------------
# Forward pass matching BLSTM.forward semantics (batch-first in/out).
# ----------------------------------------------------------------------------
@jax.jit
def blstm_forward(packed, x_btf):
    B, T, F = x_btf.shape
    layers = packed["layers"]
    H = layers[0]["whh_blk"].shape[0] // 2
    tc = _pick_time_chunk(T, B, H)

    x_tbf = jnp.transpose(x_btf, (1, 0, 2)).astype(jnp.float32)     # (T,B,F)
    x2d = x_tbf.reshape(T * B, F)                                   # time-major rows
    x2d_bf = x2d.astype(COMPUTE_DTYPE)

    hf2d = hb2d = None
    for layer, lw in enumerate(layers):
        if layer == 0:
            gates2d = input_projection(x2d_bf, lw["w_in"], lw["bias8"])
        else:
            gates2d = hidden_projection(hf2d, hb2d, lw["w_top"], lw["w_bot"],
                                        lw["bias8"])
        gates = gates2d.reshape(T, B, 8 * H)
        hf_all, hb_all = bilstm_layer(gates, lw["whh_blk"], tc)
        hf2d = hf_all.reshape(T * B, H)                             # bf16
        hb2d = hb_all.reshape(T * B, H)

    out2d = fc_residual(hf2d, hb2d, packed["fc_w_top"], packed["fc_w_bot"],
                        packed["fc_b"], x2d)
    O = packed["fc_w_top"].shape[1]
    return jnp.transpose(out2d.reshape(T, B, O), (1, 0, 2))         # (B,T,O)


# ----------------------------------------------------------------------------
# Pure-JAX f32 reference (lax.scan) for a tolerance check.
# ----------------------------------------------------------------------------
def _lstm_scan_direction(x_tbf, w_ih, w_hh, bias, reverse):
    H = w_hh.shape[1]
    B = x_tbf.shape[1]

    def step(carry, x_t):
        h, c = carry
        g = x_t @ w_ih.T + h @ w_hh.T + bias
        i = jax.nn.sigmoid(g[:, 0 * H:1 * H])
        f = jax.nn.sigmoid(g[:, 1 * H:2 * H])
        gg = jnp.tanh(g[:, 2 * H:3 * H])
        o = jax.nn.sigmoid(g[:, 3 * H:4 * H])
        c = f * c + i * gg
        h = o * jnp.tanh(c)
        return (h, c), h

    init = (jnp.zeros((B, H), jnp.float32), jnp.zeros((B, H), jnp.float32))
    _, hs = jax.lax.scan(step, init, x_tbf, reverse=reverse)
    return hs


def blstm_reference(params, x_btf):
    inp = jnp.transpose(x_btf, (1, 0, 2)).astype(jnp.float32)
    for p in params["layers"]:
        hf = _lstm_scan_direction(inp, p["fwd"]["w_ih"], p["fwd"]["w_hh"],
                                  p["fwd"]["bias"], reverse=False)
        hb = _lstm_scan_direction(inp, p["bwd"]["w_ih"], p["bwd"]["w_hh"],
                                  p["bwd"]["bias"], reverse=True)
        inp = jnp.concatenate([hf, hb], axis=-1)
    out = jnp.einsum("tbh,oh->tbo", inp, params["fc_w"]) + params["fc_b"]
    return jnp.transpose(out, (1, 0, 2)) + x_btf


# ----------------------------------------------------------------------------
if __name__ == "__main__":
    # Residual "out += x" requires output_size == input_size.
    batch, seq_len = 2, 8
    input_size, hidden_size, num_layers, output_size = 16, 32, 2, 16

    key = jax.random.PRNGKey(0)
    pkey, xkey = jax.random.split(key)

    params = init_blstm_params(pkey, input_size, hidden_size,
                               num_layers, output_size)
    x = jax.random.normal(xkey, (batch, seq_len, input_size), jnp.float32)

    packed = pack_blstm_params(params)            # one-time weight repack
    out = blstm_forward(packed, x)
    jax.block_until_ready(out)

    assert out.shape == (batch, seq_len, output_size)
    assert bool(jnp.all(jnp.isfinite(out)))

    ref = blstm_reference(params, x)
    max_err = float(jnp.max(jnp.abs(out - ref)))
    # bf16 MXU operands + approx-reciprocal sigmoid vs. an f32 scan reference.
    assert jnp.allclose(out, ref, atol=5e-2, rtol=5e-2), max_err

    print("KERNEL_OK")
</pallas_src>

<mosaic_0001>
module attributes {stable_mosaic.version = 11 : i64} {
  func.func @_matmul_bias_kernel(%arg0: i32, %arg1: i32, %arg2: memref<16x16xbf16, #tpu.memory_space<vmem>>, %arg3: memref<16x256xbf16, #tpu.memory_space<vmem>>, %arg4: memref<1x256xf32, #tpu.memory_space<vmem>>, %arg5: memref<16x256xf32, #tpu.memory_space<vmem>>) attributes {dimension_semantics = [#tpu.dimension_semantics<parallel>, #tpu.dimension_semantics<parallel>], iteration_bounds = array<i64: 1, 1>, scalar_prefetch = 0 : i64, scratch_operands = 0 : i64, tpu.core_type = #tpu.core_type<tc>, window_params = [{transform_indices = @transform_0, window_bounds = array<i64: 16, 16>}, {transform_indices = @transform_1, window_bounds = array<i64: 16, 256>}, {transform_indices = @transform_2, window_bounds = array<i64: 1, 256>}, {transform_indices = @transform_3, window_bounds = array<i64: 16, 256>}]} {
    %c0 = arith.constant 0 : index
    %c0_0 = arith.constant 0 : index
    %0 = vector.load %arg2[%c0, %c0_0] : memref<16x16xbf16, #tpu.memory_space<vmem>>, vector<16x16xbf16>
    %c0_1 = arith.constant 0 : index
    %c0_2 = arith.constant 0 : index
    %1 = vector.load %arg3[%c0_1, %c0_2] : memref<16x256xbf16, #tpu.memory_space<vmem>>, vector<16x256xbf16>
    %cst = arith.constant dense<0.000000e+00> : vector<16x256xf32>
    %2 = tpu.matmul %0, %1, %cst {dimension_numbers = #tpu.dot_dimension_numbers<[1], [0], [0], [1], [0, 0, 1, 1], [], []>} : vector<16x16xbf16>, vector<16x256xbf16>, vector<16x256xf32> -> vector<16x256xf32>
    %c0_3 = arith.constant 0 : index
    %c0_4 = arith.constant 0 : index
    %3 = vector.load %arg4[%c0_3, %c0_4] : memref<1x256xf32, #tpu.memory_space<vmem>>, vector<1x256xf32>
    %4 = vector.broadcast %3 : vector<1x256xf32> to vector<16x256xf32>
    %5 = arith.addf %2, %4 : vector<16x256xf32>
    %c0_5 = arith.constant 0 : index
    %c0_6 = arith.constant 0 : index
    %6 = vector.load %arg5[%c0_5, %c0_6] : memref<16x256xf32, #tpu.memory_space<vmem>>, vector<16x256xf32>
    tpu.vector_store %arg5[%c0_5, %c0_6], %5 {strides = array<i32>} : memref<16x256xf32, #tpu.memory_space<vmem>>, vector<16x256xf32>,
    return
  }
  func.func @transform_0(%arg0: i32, %arg1: i32) -> (i32, i32) {
    %c0_i32 = arith.constant 0 : i32
    %c0_i32_0 = arith.constant 0 : i32
    return %arg0, %c0_i32 : i32, i32
  }
  func.func @transform_1(%arg0: i32, %arg1: i32) -> (i32, i32) {
    %c0_i32 = arith.constant 0 : i32
    %c0_i32_0 = arith.constant 0 : i32
    return %c0_i32, %arg1 : i32, i32
  }
  func.func @transform_2(%arg0: i32, %arg1: i32) -> (i32, i32) {
    %c0_i32 = arith.constant 0 : i32
    %c0_i32_0 = arith.constant 0 : i32
    return %c0_i32, %arg1 : i32, i32
  }
  func.func @transform_3(%arg0: i32, %arg1: i32) -> (i32, i32) {
    %c0_i32 = arith.constant 0 : i32
    return %arg0, %arg1 : i32, i32
  }
}

module attributes {stable_mosaic.version = 11 : i64} {
  func.func @_dual_matmul_bias_kernel(%arg0: i32, %arg1: i32, %arg2: memref<16x32xbf16, #tpu.memory_space<vmem>>, %arg3: memref<16x32xbf16, #tpu.memory_space<vmem>>, %arg4: memref<32x256xbf16, #tpu.memory_space<vmem>>, %arg5: memref<32x256xbf16, #tpu.memory_space<vmem>>, %arg6: memref<1x256xf32, #tpu.memory_space<vmem>>, %arg7: memref<16x256xf32, #tpu.memory_space<vmem>>) attributes {dimension_semantics = [#tpu.dimension_semantics<parallel>, #tpu.dimension_semantics<parallel>], iteration_bounds = array<i64: 1, 1>, scalar_prefetch = 0 : i64, scratch_operands = 0 : i64, tpu.core_type = #tpu.core_type<tc>, window_params = [{transform_indices = @transform_0, window_bounds = array<i64: 16, 32>}, {transform_indices = @transform_1, window_bounds = array<i64: 16, 32>}, {transform_indices = @transform_2, window_bounds = array<i64: 32, 256>}, {transform_indices = @transform_3, window_bounds = array<i64: 32, 256>}, {transform_indices = @transform_4, window_bounds = array<i64: 1, 256>}, {transform_indices = @transform_5, window_bounds = array<i64: 16, 256>}]} {
    %c0 = arith.constant 0 : index
    %c0_0 = arith.constant 0 : index
    %0 = vector.load %arg2[%c0, %c0_0] : memref<16x32xbf16, #tpu.memory_space<vmem>>, vector<16x32xbf16>
    %c0_1 = arith.constant 0 : index
    %c0_2 = arith.constant 0 : index
    %1 = vector.load %arg4[%c0_1, %c0_2] : memref<32x256xbf16, #tpu.memory_space<vmem>>, vector<32x256xbf16>
    %cst = arith.constant dense<0.000000e+00> : vector<16x256xf32>
    %2 = tpu.matmul %0, %1, %cst {dimension_numbers = #tpu.dot_dimension_numbers<[1], [0], [0], [1], [0, 0, 1, 1], [], []>} : vector<16x32xbf16>, vector<32x256xbf16>, vector<16x256xf32> -> vector<16x256xf32>
    %c0_3 = arith.constant 0 : index
    %c0_4 = arith.constant 0 : index
    %3 = vector.load %arg3[%c0_3, %c0_4] : memref<16x32xbf16, #tpu.memory_space<vmem>>, vector<16x32xbf16>
    %c0_5 = arith.constant 0 : index
    %c0_6 = arith.constant 0 : index
    %4 = vector.load %arg5[%c0_5, %c0_6] : memref<32x256xbf16, #tpu.memory_space<vmem>>, vector<32x256xbf16>
    %cst_7 = arith.constant dense<0.000000e+00> : vector<16x256xf32>
    %5 = tpu.matmul %3, %4, %cst_7 {dimension_numbers = #tpu.dot_dimension_numbers<[1], [0], [0], [1], [0, 0, 1, 1], [], []>} : vector<16x32xbf16>, vector<32x256xbf16>, vector<16x256xf32> -> vector<16x256xf32>
    %6 = arith.addf %2, %5 : vector<16x256xf32>
    %c0_8 = arith.constant 0 : index
    %c0_9 = arith.constant 0 : index
    %7 = vector.load %arg6[%c0_8, %c0_9] : memref<1x256xf32, #tpu.memory_space<vmem>>, vector<1x256xf32>
    %8 = vector.broadcast %7 : vector<1x256xf32> to vector<16x256xf32>
    %9 = arith.addf %6, %8 : vector<16x256xf32>
    %c0_10 = arith.constant 0 : index
    %c0_11 = arith.constant 0 : index
    %10 = vector.load %arg7[%c0_10, %c0_11] : memref<16x256xf32, #tpu.memory_space<vmem>>, vector<16x256xf32>
    tpu.vector_store %arg7[%c0_10, %c0_11], %9 {strides = array<i32>} : memref<16x256xf32, #tpu.memory_space<vmem>>, vector<16x256xf32>,
    return
  }
  func.func @transform_0(%arg0: i32, %arg1: i32) -> (i32, i32) {
    %c0_i32 = arith.constant 0 : i32
    %c0_i32_0 = arith.constant 0 : i32
    return %arg0, %c0_i32 : i32, i32
  }
  func.func @transform_1(%arg0: i32, %arg1: i32) -> (i32, i32) {
    %c0_i32 = arith.constant 0 : i32
    %c0_i32_0 = arith.constant 0 : i32
    return %arg0, %c0_i32 : i32, i32
  }
  func.func @transform_2(%arg0: i32, %arg1: i32) -> (i32, i32) {
    %c0_i32 = arith.constant 0 : i32
    %c0_i32_0 = arith.constant 0 : i32
    return %c0_i32, %arg1 : i32, i32
  }
  func.func @transform_3(%arg0: i32, %arg1: i32) -> (i32, i32) {
    %c0_i32 = arith.constant 0 : i32
    %c0_i32_0 = arith.constant 0 : i32
    return %c0_i32, %arg1 : i32, i32
  }
  func.func @transform_4(%arg0: i32, %arg1: i32) -> (i32, i32) {
    %c0_i32 = arith.constant 0 : i32
    %c0_i32_0 = arith.constant 0 : i32
    return %c0_i32, %arg1 : i32, i32
  }
  func.func @transform_5(%arg0: i32, %arg1: i32) -> (i32, i32) {
    %c0_i32 = arith.constant 0 : i32
    return %arg0, %arg1 : i32, i32
  }
}

module attributes {stable_mosaic.version = 11 : i64} {
  func.func @_dual_matmul_bias_res_kernel(%arg0: i32, %arg1: memref<16x32xbf16, #tpu.memory_space<vmem>>, %arg2: memref<16x32xbf16, #tpu.memory_space<vmem>>, %arg3: memref<32x16xbf16, #tpu.memory_space<vmem>>, %arg4: memref<32x16xbf16, #tpu.memory_space<vmem>>, %arg5: memref<1x16xf32, #tpu.memory_space<vmem>>, %arg6: memref<16x16xf32, #tpu.memory_space<vmem>>, %arg7: memref<16x16xf32, #tpu.memory_space<vmem>>) attributes {dimension_semantics = [#tpu.dimension_semantics<parallel>], iteration_bounds = array<i64: 1>, scalar_prefetch = 0 : i64, scratch_operands = 0 : i64, tpu.core_type = #tpu.core_type<tc>, window_params = [{transform_indices = @transform_0, window_bounds = array<i64: 16, 32>}, {transform_indices = @transform_1, window_bounds = array<i64: 16, 32>}, {pipeline_mode = #tpu.pipeline_mode<synchronous>, transform_indices = @transform_2, window_bounds = array<i64: 32, 16>}, {pipeline_mode = #tpu.pipeline_mode<synchronous>, transform_indices = @transform_3, window_bounds = array<i64: 32, 16>}, {pipeline_mode = #tpu.pipeline_mode<synchronous>, transform_indices = @transform_4, window_bounds = array<i64: 1, 16>}, {transform_indices = @transform_5, window_bounds = array<i64: 16, 16>}, {transform_indices = @transform_6, window_bounds = array<i64: 16, 16>}]} {
    %c0 = arith.constant 0 : index
    %c0_0 = arith.constant 0 : index
    %0 = vector.load %arg1[%c0, %c0_0] : memref<16x32xbf16, #tpu.memory_space<vmem>>, vector<16x32xbf16>
    %c0_1 = arith.constant 0 : index
    %c0_2 = arith.constant 0 : index
    %1 = vector.load %arg3[%c0_1, %c0_2] : memref<32x16xbf16, #tpu.memory_space<vmem>>, vector<32x16xbf16>
    %cst = arith.constant dense<0.000000e+00> : vector<16x16xf32>
    %2 = tpu.matmul %0, %1, %cst {dimension_numbers = #tpu.dot_dimension_numbers<[1], [0], [0], [1], [0, 0, 1, 1], [], []>} : vector<16x32xbf16>, vector<32x16xbf16>, vector<16x16xf32> -> vector<16x16xf32>
    %c0_3 = arith.constant 0 : index
    %c0_4 = arith.constant 0 : index
    %3 = vector.load %arg2[%c0_3, %c0_4] : memref<16x32xbf16, #tpu.memory_space<vmem>>, vector<16x32xbf16>
    %c0_5 = arith.constant 0 : index
    %c0_6 = arith.constant 0 : index
    %4 = vector.load %arg4[%c0_5, %c0_6] : memref<32x16xbf16, #tpu.memory_space<vmem>>, vector<32x16xbf16>
    %cst_7 = arith.constant dense<0.000000e+00> : vector<16x16xf32>
    %5 = tpu.matmul %3, %4, %cst_7 {dimension_numbers = #tpu.dot_dimension_numbers<[1], [0], [0], [1], [0, 0, 1, 1], [], []>} : vector<16x32xbf16>, vector<32x16xbf16>, vector<16x16xf32> -> vector<16x16xf32>
    %6 = arith.addf %2, %5 : vector<16x16xf32>
    %c0_8 = arith.constant 0 : index
    %c0_9 = arith.constant 0 : index
    %7 = vector.load %arg5[%c0_8, %c0_9] : memref<1x16xf32, #tpu.memory_space<vmem>>, vector<1x16xf32>
    %8 = vector.broadcast %7 : vector<1x16xf32> to vector<16x16xf32>
    %9 = arith.addf %6, %8 : vector<16x16xf32>
    %c0_10 = arith.constant 0 : index
    %c0_11 = arith.constant 0 : index
    %10 = vector.load %arg6[%c0_10, %c0_11] : memref<16x16xf32, #tpu.memory_space<vmem>>, vector<16x16xf32>
    %11 = arith.addf %9, %10 : vector<16x16xf32>
    %c0_12 = arith.constant 0 : index
    %c0_13 = arith.constant 0 : index
    %12 = vector.load %arg7[%c0_12, %c0_13] : memref<16x16xf32, #tpu.memory_space<vmem>>, vector<16x16xf32>
    tpu.vector_store %arg7[%c0_12, %c0_13], %11 {strides = array<i32>} : memref<16x16xf32, #tpu.memory_space<vmem>>, vector<16x16xf32>,
    return
  }
  func.func @transform_0(%arg0: i32) -> (i32, i32) {
    %c0_i32 = arith.constant 0 : i32
    %c0_i32_0 = arith.constant 0 : i32
    return %arg0, %c0_i32 : i32, i32
  }
  func.func @transform_1(%arg0: i32) -> (i32, i32) {
    %c0_i32 = arith.constant 0 : i32
    %c0_i32_0 = arith.constant 0 : i32
    return %arg0, %c0_i32 : i32, i32
  }
  func.func @transform_2(%arg0: i32) -> (i32, i32) {
    %c0_i32 = arith.constant 0 : i32
    %c0_i32_0 = arith.constant 0 : i32
    %c0_i32_1 = arith.constant 0 : i32
    return %c0_i32, %c0_i32_0 : i32, i32
  }
  func.func @transform_3(%arg0: i32) -> (i32, i32) {
    %c0_i32 = arith.constant 0 : i32
    %c0_i32_0 = arith.constant 0 : i32
    %c0_i32_1 = arith.constant 0 : i32
    return %c0_i32, %c0_i32_0 : i32, i32
  }
  func.func @transform_4(%arg0: i32) -> (i32, i32) {
    %c0_i32 = arith.constant 0 : i32
    %c0_i32_0 = arith.constant 0 : i32
    %c0_i32_1 = arith.constant 0 : i32
    return %c0_i32, %c0_i32_0 : i32, i32
  }
  func.func @transform_5(%arg0: i32) -> (i32, i32) {
    %c0_i32 = arith.constant 0 : i32
    %c0_i32_0 = arith.constant 0 : i32
    return %arg0, %c0_i32 : i32, i32
  }
  func.func @transform_6(%arg0: i32) -> (i32, i32) {
    %c0_i32 = arith.constant 0 : i32
    %c0_i32_0 = arith.constant 0 : i32
    return %arg0, %c0_i32 : i32, i32
  }
}

module attributes {stable_mosaic.version = 11 : i64} {
  func.func @_bilstm_kernel(%arg0: i32, %arg1: memref<8x2x128xf32, #tpu.memory_space<vmem>>, %arg2: memref<8x2x128xf32, #tpu.memory_space<vmem>>, %arg3: memref<64x256xbf16, #tpu.memory_space<vmem>>, %arg4: memref<8x2x32xbf16, #tpu.memory_space<vmem>>, %arg5: memref<8x2x32xbf16, #tpu.memory_space<vmem>>, %arg6: memref<2x32xf32, #tpu.memory_space<vmem>>, %arg7: memref<2x32xf32, #tpu.memory_space<vmem>>, %arg8: memref<2x32xf32, #tpu.memory_space<vmem>>, %arg9: memref<2x32xf32, #tpu.memory_space<vmem>>) attributes {dimension_semantics = [#tpu.dimension_semantics<arbitrary>], iteration_bounds = array<i64: 1>, scalar_prefetch = 0 : i64, scratch_operands = 4 : i64, tpu.core_type = #tpu.core_type<tc>, window_params = [{transform_indices = @transform_0, window_bounds = array<i64: 8, 2, 128>}, {transform_indices = @transform_1, window_bounds = array<i64: 8, 2, 128>}, {pipeline_mode = #tpu.pipeline_mode<synchronous>, transform_indices = @transform_2, window_bounds = array<i64: 64, 256>}, {transform_indices = @transform_3, window_bounds = array<i64: 8, 2, 32>}, {transform_indices = @transform_4, window_bounds = array<i64: 8, 2, 32>}]} {
    %c0_i32 = arith.constant 0 : i32
    %0 = arith.cmpi eq, %arg0, %c0_i32 : i32
    %1 = arith.extui %0 : i1 to i32
    %c0_i32_0 = arith.constant 0 : i32
    %2 = arith.cmpi ne, %1, %c0_i32_0 : i32
    scf.if %2 {
      %cst_210 = arith.constant 0.000000e+00 : f32
      %612 = vector.broadcast %cst_210 : f32 to vector<2x32xf32>
      %c0_211 = arith.constant 0 : index
      %c0_212 = arith.constant 0 : index
      %613 = vector.load %arg6[%c0_211, %c0_212] : memref<2x32xf32, #tpu.memory_space<vmem>>, vector<2x32xf32>
      tpu.vector_store %arg6[%c0_211, %c0_212], %612 {strides = array<i32>} : memref<2x32xf32, #tpu.memory_space<vmem>>, vector<2x32xf32>,
      %cst_213 = arith.constant 0.000000e+00 : f32
      %614 = vector.broadcast %cst_213 : f32 to vector<2x32xf32>
      %c0_214 = arith.constant 0 : index
      %c0_215 = arith.constant 0 : index
      %615 = vector.load %arg7[%c0_214, %c0_215] : memref<2x32xf32, #tpu.memory_space<vmem>>, vector<2x32xf32>
      tpu.vector_store %arg7[%c0_214, %c0_215], %614 {strides = array<i32>} : memref<2x32xf32, #tpu.memory_space<vmem>>, vector<2x32xf32>,
      %cst_216 = arith.constant 0.000000e+00 : f32
      %616 = vector.broadcast %cst_216 : f32 to vector<2x32xf32>
      %c0_217 = arith.constant 0 : index
      %c0_218 = arith.constant 0 : index
      %617 = vector.load %arg8[%c0_217, %c0_218] : memref<2x32xf32, #tpu.memory_space<vmem>>, vector<2x32xf32>
      tpu.vector_store %arg8[%c0_217, %c0_218], %616 {strides = array<i32>} : memref<2x32xf32, #tpu.memory_space<vmem>>, vector<2x32xf32>,
      %cst_219 = arith.constant 0.000000e+00 : f32
      %618 = vector.broadcast %cst_219 : f32 to vector<2x32xf32>
      %c0_220 = arith.constant 0 : index
      %c0_221 = arith.constant 0 : index
      %619 = vector.load %arg9[%c0_220, %c0_221] : memref<2x32xf32, #tpu.memory_space<vmem>>, vector<2x32xf32>
      tpu.vector_store %arg9[%c0_220, %c0_221], %618 {strides = array<i32>} : memref<2x32xf32, #tpu.memory_space<vmem>>, vector<2x32xf32>,
    } else {
    }
    %c0 = arith.constant 0 : index
    %c0_1 = arith.constant 0 : index
    %3 = vector.load %arg3[%c0, %c0_1] : memref<64x256xbf16, #tpu.memory_space<vmem>>, vector<64x256xbf16>
    %c0_2 = arith.constant 0 : index
    %c0_3 = arith.constant 0 : index
    %4 = vector.load %arg6[%c0_2, %c0_3] : memref<2x32xf32, #tpu.memory_space<vmem>>, vector<2x32xf32>
    %c0_4 = arith.constant 0 : index
    %c0_5 = arith.constant 0 : index
    %5 = vector.load %arg7[%c0_4, %c0_5] : memref<2x32xf32, #tpu.memory_space<vmem>>, vector<2x32xf32>
    %c0_6 = arith.constant 0 : index
    %c0_7 = arith.constant 0 : index
    %6 = vector.load %arg8[%c0_6, %c0_7] : memref<2x32xf32, #tpu.memory_space<vmem>>, vector<2x32xf32>
    %c0_8 = arith.constant 0 : index
    %c0_9 = arith.constant 0 : index
    %7 = vector.load %arg9[%c0_8, %c0_9] : memref<2x32xf32, #tpu.memory_space<vmem>>, vector<2x32xf32>
    %8 = tpu.concatenate %4, %6 in 1 : vector<2x32xf32>, vector<2x32xf32> -> vector<2x64xf32>
    %9 = arith.truncf %8 : vector<2x64xf32> to vector<2x64xbf16>
    %cst = arith.constant dense<0.000000e+00> : vector<2x256xf32>
    %10 = tpu.matmul %9, %3, %cst {dimension_numbers = #tpu.dot_dimension_numbers<[1], [0], [0], [1], [0, 0, 1, 1], [], []>} : vector<2x64xbf16>, vector<64x256xbf16>, vector<2x256xf32> -> vector<2x256xf32>
    %c0_10 = arith.constant 0 : index
    %c0_11 = arith.constant 0 : index
    %c0_12 = arith.constant 0 : index
    %11 = vector.load %arg1[%c0_10, %c0_11, %c0_12] : memref<8x2x128xf32, #tpu.memory_space<vmem>>, vector<1x2x128xf32>
    %12 = vector.shape_cast %11 : vector<1x2x128xf32> to vector<2x128xf32>
    %13 = vector.extract_strided_slice %10 {offsets = [0, 0], sizes = [2, 128], strides = [1, 1]} : vector<2x256xf32> to vector<2x128xf32>
    %14 = arith.addf %12, %13 : vector<2x128xf32>
    %c7 = arith.constant 7 : index
    %c0_13 = arith.constant 0 : index
    %c0_14 = arith.constant 0 : index
    %15 = vector.load %arg2[%c7, %c0_13, %c0_14] : memref<8x2x128xf32, #tpu.memory_space<vmem>>, vector<1x2x128xf32>
    %16 = vector.shape_cast %15 : vector<1x2x128xf32> to vector<2x128xf32>
    %17 = vector.extract_strided_slice %10 {offsets = [0, 128], sizes = [2, 128], strides = [1, 1]} : vector<2x256xf32> to vector<2x128xf32>
    %18 = arith.addf %16, %17 : vector<2x128xf32>
    %19 = vector.extract_strided_slice %14 {offsets = [0, 0], sizes = [2, 32], strides = [1, 1]} : vector<2x128xf32> to vector<2x32xf32>
    %cst_15 = arith.constant 0.000000e+00 : f32
    %20 = vector.broadcast %cst_15 : f32 to vector<2x32xf32>
    %21 = arith.subf %20, %19 : vector<2x32xf32>
    %22 = math.exp %21 : vector<2x32xf32>
    %cst_16 = arith.constant 1.000000e+00 : f32
    %23 = vector.broadcast %cst_16 : f32 to vector<2x32xf32>
    %24 = arith.addf %23, %22 : vector<2x32xf32>
    %25 = tpu.reciprocal %24 {approx = true} : vector<2x32xf32> -> vector<2x32xf32>
    %26 = vector.extract_strided_slice %14 {offsets = [0, 32], sizes = [2, 32], strides = [1, 1]} : vector<2x128xf32> to vector<2x32xf32>
    %cst_17 = arith.constant 0.000000e+00 : f32
    %27 = vector.broadcast %cst_17 : f32 to vector<2x32xf32>
    %28 = arith.subf %27, %26 : vector<2x32xf32>
    %29 = math.exp %28 : vector<2x32xf32>
    %cst_18 = arith.constant 1.000000e+00 : f32
    %30 = vector.broadcast %cst_18 : f32 to vector<2x32xf32>
    %31 = arith.addf %30, %29 : vector<2x32xf32>
    %32 = tpu.reciprocal %31 {approx = true} : vector<2x32xf32> -> vector<2x32xf32>
    %33 = vector.extract_strided_slice %14 {offsets = [0, 64], sizes = [2, 32], strides = [1, 1]} : vector<2x128xf32> to vector<2x32xf32>
    %34 = math.tanh %33 : vector<2x32xf32>
    %35 = vector.extract_strided_slice %14 {offsets = [0, 96], sizes = [2, 32], strides = [1, 1]} : vector<2x128xf32> to vector<2x32xf32>
    %cst_19 = arith.constant 0.000000e+00 : f32
    %36 = vector.broadcast %cst_19 : f32 to vector<2x32xf32>
    %37 = arith.subf %36, %35 : vector<2x32xf32>
    %38 = math.exp %37 : vector<2x32xf32>
    %cst_20 = arith.constant 1.000000e+00 : f32
    %39 = vector.broadcast %cst_20 : f32 to vector<2x32xf32>
    %40 = arith.addf %39, %38 : vector<2x32xf32>
    %41 = tpu.reciprocal %40 {approx = true} : vector<2x32xf32> -> vector<2x32xf32>
    %42 = arith.mulf %32, %5 : vector<2x32xf32>
    %43 = arith.mulf %25, %34 : vector<2x32xf32>
    %44 = arith.addf %42, %43 : vector<2x32xf32>
    %45 = math.tanh %44 : vector<2x32xf32>
    %46 = arith.mulf %41, %45 : vector<2x32xf32>
    %47 = vector.extract_strided_slice %18 {offsets = [0, 0], sizes = [2, 32], strides = [1, 1]} : vector<2x128xf32> to vector<2x32xf32>
    %cst_21 = arith.constant 0.000000e+00 : f32
    %48 = vector.broadcast %cst_21 : f32 to vector<2x32xf32>
    %49 = arith.subf %48, %47 : vector<2x32xf32>
    %50 = math.exp %49 : vector<2x32xf32>
    %cst_22 = arith.constant 1.000000e+00 : f32
    %51 = vector.broadcast %cst_22 : f32 to vector<2x32xf32>
    %52 = arith.addf %51, %50 : vector<2x32xf32>
    %53 = tpu.reciprocal %52 {approx = true} : vector<2x32xf32> -> vector<2x32xf32>
    %54 = vector.extract_strided_slice %18 {offsets = [0, 32], sizes = [2, 32], strides = [1, 1]} : vector<2x128xf32> to vector<2x32xf32>
    %cst_23 = arith.constant 0.000000e+00 : f32
    %55 = vector.broadcast %cst_23 : f32 to vector<2x32xf32>
    %56 = arith.subf %55, %54 : vector<2x32xf32>
    %57 = math.exp %56 : vector<2x32xf32>
    %cst_24 = arith.constant 1.000000e+00 : f32
    %58 = vector.broadcast %cst_24 : f32 to vector<2x32xf32>
    %59 = arith.addf %58, %57 : vector<2x32xf32>
    %60 = tpu.reciprocal %59 {approx = true} : vector<2x32xf32> -> vector<2x32xf32>
    %61 = vector.extract_strided_slice %18 {offsets = [0, 64], sizes = [2, 32], strides = [1, 1]} : vector<2x128xf32> to vector<2x32xf32>
    %62 = math.tanh %61 : vector<2x32xf32>
    %63 = vector.extract_strided_slice %18 {offsets = [0, 96], sizes = [2, 32], strides = [1, 1]} : vector<2x128xf32> to vector<2x32xf32>
    %cst_25 = arith.constant 0.000000e+00 : f32
    %64 = vector.broadcast %cst_25 : f32 to vector<2x32xf32>
    %65 = arith.subf %64, %63 : vector<2x32xf32>
    %66 = math.exp %65 : vector<2x32xf32>
    %cst_26 = arith.constant 1.000000e+00 : f32
    %67 = vector.broadcast %cst_26 : f32 to vector<2x32xf32>
    %68 = arith.addf %67, %66 : vector<2x32xf32>
    %69 = tpu.reciprocal %68 {approx = true} : vector<2x32xf32> -> vector<2x32xf32>
    %70 = arith.mulf %60, %7 : vector<2x32xf32>
    %71 = arith.mulf %53, %62 : vector<2x32xf32>
    %72 = arith.addf %70, %71 : vector<2x32xf32>
    %73 = math.tanh %72 : vector<2x32xf32>
    %74 = arith.mulf %69, %73 : vector<2x32xf32>
    %75 = arith.truncf %46 : vector<2x32xf32> to vector<2x32xbf16>
    %c0_27 = arith.constant 0 : index
    %c0_28 = arith.constant 0 : index
    %c0_29 = arith.constant 0 : index
    %76 = vector.load %arg4[%c0_27, %c0_28, %c0_29] : memref<8x2x32xbf16, #tpu.memory_space<vmem>>, vector<1x2x32xbf16>
    %77 = vector.shape_cast %76 : vector<1x2x32xbf16> to vector<2x32xbf16>
    %78 = vector.shape_cast %75 : vector<2x32xbf16> to vector<1x2x32xbf16>
    tpu.vector_store %arg4[%c0_27, %c0_28, %c0_29], %78 {strides = array<i32>} : memref<8x2x32xbf16, #tpu.memory_space<vmem>>, vector<1x2x32xbf16>,
    %79 = arith.truncf %74 : vector<2x32xf32> to vector<2x32xbf16>
    %c7_30 = arith.constant 7 : index
    %c0_31 = arith.constant 0 : index
    %c0_32 = arith.constant 0 : index
    %80 = vector.load %arg5[%c7_30, %c0_31, %c0_32] : memref<8x2x32xbf16, #tpu.memory_space<vmem>>, vector<1x2x32xbf16>
    %81 = vector.shape_cast %80 : vector<1x2x32xbf16> to vector<2x32xbf16>
    %82 = vector.shape_cast %79 : vector<2x32xbf16> to vector<1x2x32xbf16>
    tpu.vector_store %arg5[%c7_30, %c0_31, %c0_32], %82 {strides = array<i32>} : memref<8x2x32xbf16, #tpu.memory_space<vmem>>, vector<1x2x32xbf16>,
    %83 = tpu.concatenate %46, %74 in 1 : vector<2x32xf32>, vector<2x32xf32> -> vector<2x64xf32>
    %84 = arith.truncf %83 : vector<2x64xf32> to vector<2x64xbf16>
    %cst_33 = arith.constant dense<0.000000e+00> : vector<2x256xf32>
    %85 = tpu.matmul %84, %3, %cst_33 {dimension_numbers = #tpu.dot_dimension_numbers<[1], [0], [0], [1], [0, 0, 1, 1], [], []>} : vector<2x64xbf16>, vector<64x256xbf16>, vector<2x256xf32> -> vector<2x256xf32>
    %c1 = arith.constant 1 : index
    %c0_34 = arith.constant 0 : index
    %c0_35 = arith.constant 0 : index
    %86 = vector.load %arg1[%c1, %c0_34, %c0_35] : memref<8x2x128xf32, #tpu.memory_space<vmem>>, vector<1x2x128xf32>
    %87 = vector.shape_cast %86 : vector<1x2x128xf32> to vector<2x128xf32>
    %88 = vector.extract_strided_slice %85 {offsets = [0, 0], sizes = [2, 128], strides = [1, 1]} : vector<2x256xf32> to vector<2x128xf32>
    %89 = arith.addf %87, %88 : vector<2x128xf32>
    %c6 = arith.constant 6 : index
    %c0_36 = arith.constant 0 : index
    %c0_37 = arith.constant 0 : index
    %90 = vector.load %arg2[%c6, %c0_36, %c0_37] : memref<8x2x128xf32, #tpu.memory_space<vmem>>, vector<1x2x128xf32>
    %91 = vector.shape_cast %90 : vector<1x2x128xf32> to vector<2x128xf32>
    %92 = vector.extract_strided_slice %85 {offsets = [0, 128], sizes = [2, 128], strides = [1, 1]} : vector<2x256xf32> to vector<2x128xf32>
    %93 = arith.addf %91, %92 : vector<2x128xf32>
    %94 = vector.extract_strided_slice %89 {offsets = [0, 0], sizes = [2, 32], strides = [1, 1]} : vector<2x128xf32> to vector<2x32xf32>
    %cst_38 = arith.constant 0.000000e+00 : f32
    %95 = vector.broadcast %cst_38 : f32 to vector<2x32xf32>
    %96 = arith.subf %95, %94 : vector<2x32xf32>
    %97 = math.exp %96 : vector<2x32xf32>
    %cst_39 = arith.constant 1.000000e+00 : f32
    %98 = vector.broadcast %cst_39 : f32 to vector<2x32xf32>
    %99 = arith.addf %98, %97 : vector<2x32xf32>
    %100 = tpu.reciprocal %99 {approx = true} : vector<2x32xf32> -> vector<2x32xf32>
    %101 = vector.extract_strided_slice %89 {offsets = [0, 32], sizes = [2, 32], strides = [1, 1]} : vector<2x128xf32> to vector<2x32xf32>
    %cst_40 = arith.constant 0.000000e+00 : f32
    %102 = vector.broadcast %cst_40 : f32 to vector<2x32xf32>
    %103 = arith.subf %102, %101 : vector<2x32xf32>
    %104 = math.exp %103 : vector<2x32xf32>
    %cst_41 = arith.constant 1.000000e+00 : f32
    %105 = vector.broadcast %cst_41 : f32 to vector<2x32xf32>
    %106 = arith.addf %105, %104 : vector<2x32xf32>
    %107 = tpu.reciprocal %106 {approx = true} : vector<2x32xf32> -> vector<2x32xf32>
    %108 = vector.extract_strided_slice %89 {offsets = [0, 64], sizes = [2, 32], strides = [1, 1]} : vector<2x128xf32> to vector<2x32xf32>
    %109 = math.tanh %108 : vector<2x32xf32>
    %110 = vector.extract_strided_slice %89 {offsets = [0, 96], sizes = [2, 32], strides = [1, 1]} : vector<2x128xf32> to vector<2x32xf32>
    %cst_42 = arith.constant 0.000000e+00 : f32
    %111 = vector.broadcast %cst_42 : f32 to vector<2x32xf32>
    %112 = arith.subf %111, %110 : vector<2x32xf32>
    %113 = math.exp %112 : vector<2x32xf32>
    %cst_43 = arith.constant 1.000000e+00 : f32
    %114 = vector.broadcast %cst_43 : f32 to vector<2x32xf32>
    %115 = arith.addf %114, %113 : vector<2x32xf32>
    %116 = tpu.reciprocal %115 {approx = true} : vector<2x32xf32> -> vector<2x32xf32>
    %117 = arith.mulf %107, %44 : vector<2x32xf32>
    %118 = arith.mulf %100, %109 : vector<2x32xf32>
    %119 = arith.addf %117, %118 : vector<2x32xf32>
    %120 = math.tanh %119 : vector<2x32xf32>
    %121 = arith.mulf %116, %120 : vector<2x32xf32>
    %122 = vector.extract_strided_slice %93 {offsets = [0, 0], sizes = [2, 32], strides = [1, 1]} : vector<2x128xf32> to vector<2x32xf32>
    %cst_44 = arith.constant 0.000000e+00 : f32
    %123 = vector.broadcast %cst_44 : f32 to vector<2x32xf32>
    %124 = arith.subf %123, %122 : vector<2x32xf32>
    %125 = math.exp %124 : vector<2x32xf32>
    %cst_45 = arith.constant 1.000000e+00 : f32
    %126 = vector.broadcast %cst_45 : f32 to vector<2x32xf32>
    %127 = arith.addf %126, %125 : vector<2x32xf32>
    %128 = tpu.reciprocal %127 {approx = true} : vector<2x32xf32> -> vector<2x32xf32>
    %129 = vector.extract_strided_slice %93 {offsets = [0, 32], sizes = [2, 32], strides = [1, 1]} : vector<2x128xf32> to vector<2x32xf32>
    %cst_46 = arith.constant 0.000000e+00 : f32
    %130 = vector.broadcast %cst_46 : f32 to vector<2x32xf32>
    %131 = arith.subf %130, %129 : vector<2x32xf32>
    %132 = math.exp %131 : vector<2x32xf32>
    %cst_47 = arith.constant 1.000000e+00 : f32
    %133 = vector.broadcast %cst_47 : f32 to vector<2x32xf32>
    %134 = arith.addf %133, %132 : vector<2x32xf32>
    %135 = tpu.reciprocal %134 {approx = true} : vector<2x32xf32> -> vector<2x32xf32>
    %136 = vector.extract_strided_slice %93 {offsets = [0, 64], sizes = [2, 32], strides = [1, 1]} : vector<2x128xf32> to vector<2x32xf32>
    %137 = math.tanh %136 : vector<2x32xf32>
    %138 = vector.extract_strided_slice %93 {offsets = [0, 96], sizes = [2, 32], strides = [1, 1]} : vector<2x128xf32> to vector<2x32xf32>
    %cst_48 = arith.constant 0.000000e+00 : f32
    %139 = vector.broadcast %cst_48 : f32 to vector<2x32xf32>
    %140 = arith.subf %139, %138 : vector<2x32xf32>
    %141 = math.exp %140 : vector<2x32xf32>
    %cst_49 = arith.constant 1.000000e+00 : f32
    %142 = vector.broadcast %cst_49 : f32 to vector<2x32xf32>
    %143 = arith.addf %142, %141 : vector<2x32xf32>
    %144 = tpu.reciprocal %143 {approx = true} : vector<2x32xf32> -> vector<2x32xf32>
    %145 = arith.mulf %135, %72 : vector<2x32xf32>
    %146 = arith.mulf %128, %137 : vector<2x32xf32>
    %147 = arith.addf %145, %146 : vector<2x32xf32>
    %148 = math.tanh %147 : vector<2x32xf32>
    %149 = arith.mulf %144, %148 : vector<2x32xf32>
    %150 = arith.truncf %121 : vector<2x32xf32> to vector<2x32xbf16>
    %c1_50 = arith.constant 1 : index
    %c0_51 = arith.constant 0 : index
    %c0_52 = arith.constant 0 : index
    %151 = vector.load %arg4[%c1_50, %c0_51, %c0_52] : memref<8x2x32xbf16, #tpu.memory_space<vmem>>, vector<1x2x32xbf16>
    %152 = vector.shape_cast %151 : vector<1x2x32xbf16> to vector<2x32xbf16>
    %153 = vector.shape_cast %150 : vector<2x32xbf16> to vector<1x2x32xbf16>
    tpu.vector_store %arg4[%c1_50, %c0_51, %c0_52], %153 {strides = array<i32>} : memref<8x2x32xbf16, #tpu.memory_space<vmem>>, vector<1x2x32xbf16>,
    %154 = arith.truncf %149 : vector<2x32xf32> to vector<2x32xbf16>
    %c6_53 = arith.constant 6 : index
    %c0_54 = arith.constant 0 : index
    %c0_55 = arith.constant 0 : index
    %155 = vector.load %arg5[%c6_53, %c0_54, %c0_55] : memref<8x2x32xbf16, #tpu.memory_space<vmem>>, vector<1x2x32xbf16>
    %156 = vector.shape_cast %155 : vector<1x2x32xbf16> to vector<2x32xbf16>
    %157 = vector.shape_cast %154 : vector<2x32xbf16> to vector<1x2x32xbf16>
    tpu.vector_store %arg5[%c6_53, %c0_54, %c0_55], %157 {strides = array<i32>} : memref<8x2x32xbf16, #tpu.memory_space<vmem>>, vector<1x2x32xbf16>,
    %158 = tpu.concatenate %121, %149 in 1 : vector<2x32xf32>, vector<2x32xf32> -> vector<2x64xf32>
    %159 = arith.truncf %158 : vector<2x64xf32> to vector<2x64xbf16>
    %cst_56 = arith.constant dense<0.000000e+00> : vector<2x256xf32>
    %160 = tpu.matmul %159, %3, %cst_56 {dimension_numbers = #tpu.dot_dimension_numbers<[1], [0], [0], [1], [0, 0, 1, 1], [], []>} : vector<2x64xbf16>, vector<64x256xbf16>, vector<2x256xf32> -> vector<2x256xf32>
    %c2 = arith.constant 2 : index
    %c0_57 = arith.constant 0 : index
    %c0_58 = arith.constant 0 : index
    %161 = vector.load %arg1[%c2, %c0_57, %c0_58] : memref<8x2x128xf32, #tpu.memory_space<vmem>>, vector<1x2x128xf32>
    %162 = vector.shape_cast %161 : vector<1x2x128xf32> to vector<2x128xf32>
    %163 = vector.extract_strided_slice %160 {offsets = [0, 0], sizes = [2, 128], strides = [1, 1]} : vector<2x256xf32> to vector<2x128xf32>
    %164 = arith.addf %162, %163 : vector<2x128xf32>
    %c5 = arith.constant 5 : index
    %c0_59 = arith.constant 0 : index
    %c0_60 = arith.constant 0 : index
    %165 = vector.load %arg2[%c5, %c0_59, %c0_60] : memref<8x2x128xf32, #tpu.memory_space<vmem>>, vector<1x2x128xf32>
    %166 = vector.shape_cast %165 : vector<1x2x128xf32> to vector<2x128xf32>
    %167 = vector.extract_strided_slice %160 {offsets = [0, 128], sizes = [2, 128], strides = [1, 1]} : vector<2x256xf32> to vector<2x128xf32>
    %168 = arith.addf %166, %167 : vector<2x128xf32>
    %169 = vector.extract_strided_slice %164 {offsets = [0, 0], sizes = [2, 32], strides = [1, 1]} : vector<2x128xf32> to vector<2x32xf32>
    %cst_61 = arith.constant 0.000000e+00 : f32
    %170 = vector.broadcast %cst_61 : f32 to vector<2x32xf32>
    %171 = arith.subf %170, %169 : vector<2x32xf32>
    %172 = math.exp %171 : vector<2x32xf32>
    %cst_62 = arith.constant 1.000000e+00 : f32
    %173 = vector.broadcast %cst_62 : f32 to vector<2x32xf32>
    %174 = arith.addf %173, %172 : vector<2x32xf32>
    %175 = tpu.reciprocal %174 {approx = true} : vector<2x32xf32> -> vector<2x32xf32>
    %176 = vector.extract_strided_slice %164 {offsets = [0, 32], sizes = [2, 32], strides = [1, 1]} : vector<2x128xf32> to vector<2x32xf32>
    %cst_63 = arith.constant 0.000000e+00 : f32
    %177 = vector.broadcast %cst_63 : f32 to vector<2x32xf32>
    %178 = arith.subf %177, %176 : vector<2x32xf32>
    %179 = math.exp %178 : vector<2x32xf32>
    %cst_64 = arith.constant 1.000000e+00 : f32
    %180 = vector.broadcast %cst_64 : f32 to vector<2x32xf32>
    %181 = arith.addf %180, %179 : vector<2x32xf32>
    %182 = tpu.reciprocal %181 {approx = true} : vector<2x32xf32> -> vector<2x32xf32>
    %183 = vector.extract_strided_slice %164 {offsets = [0, 64], sizes = [2, 32], strides = [1, 1]} : vector<2x128xf32> to vector<2x32xf32>
    %184 = math.tanh %183 : vector<2x32xf32>
    %185 = vector.extract_strided_slice %164 {offsets = [0, 96], sizes = [2, 32], strides = [1, 1]} : vector<2x128xf32> to vector<2x32xf32>
    %cst_65 = arith.constant 0.000000e+00 : f32
    %186 = vector.broadcast %cst_65 : f32 to vector<2x32xf32>
    %187 = arith.subf %186, %185 : vector<2x32xf32>
    %188 = math.exp %187 : vector<2x32xf32>
    %cst_66 = arith.constant 1.000000e+00 : f32
    %189 = vector.broadcast %cst_66 : f32 to vector<2x32xf32>
    %190 = arith.addf %189, %188 : vector<2x32xf32>
    %191 = tpu.reciprocal %190 {approx = true} : vector<2x32xf32> -> vector<2x32xf32>
    %192 = arith.mulf %182, %119 : vector<2x32xf32>
    %193 = arith.mulf %175, %184 : vector<2x32xf32>
    %194 = arith.addf %192, %193 : vector<2x32xf32>
    %195 = math.tanh %194 : vector<2x32xf32>
    %196 = arith.mulf %191, %195 : vector<2x32xf32>
    %197 = vector.extract_strided_slice %168 {offsets = [0, 0], sizes = [2, 32], strides = [1, 1]} : vector<2x128xf32> to vector<2x32xf32>
    %cst_67 = arith.constant 0.000000e+00 : f32
    %198 = vector.broadcast %cst_67 : f32 to vector<2x32xf32>
    %199 = arith.subf %198, %197 : vector<2x32xf32>
    %200 = math.exp %199 : vector<2x32xf32>
    %cst_68 = arith.constant 1.000000e+00 : f32
    %201 = vector.broadcast %cst_68 : f32 to vector<2x32xf32>
    %202 = arith.addf %201, %200 : vector<2x32xf32>
    %203 = tpu.reciprocal %202 {approx = true} : vector<2x32xf32> -> vector<2x32xf32>
    %204 = vector.extract_strided_slice %168 {offsets = [0, 32], sizes = [2, 32], strides = [1, 1]} : vector<2x128xf32> to vector<2x32xf32>
    %cst_69 = arith.constant 0.000000e+00 : f32
    %205 = vector.broadcast %cst_69 : f32 to vector<2x32xf32>
    %206 = arith.subf %205, %204 : vector<2x32xf32>
    %207 = math.exp %206 : vector<2x32xf32>
    %cst_70 = arith.constant 1.000000e+00 : f32
    %208 = vector.broadcast %cst_70 : f32 to vector<2x32xf32>
    %209 = arith.addf %208, %207 : vector<2x32xf32>
    %210 = tpu.reciprocal %209 {approx = true} : vector<2x32xf32> -> vector<2x32xf32>
    %211 = vector.extract_strided_slice %168 {offsets = [0, 64], sizes = [2, 32], strides = [1, 1]} : vector<2x128xf32> to vector<2x32xf32>
    %212 = math.tanh %211 : vector<2x32xf32>
    %213 = vector.extract_strided_slice %168 {offsets = [0, 96], sizes = [2, 32], strides = [1, 1]} : vector<2x128xf32> to vector<2x32xf32>
    %cst_71 = arith.constant 0.000000e+00 : f32
    %214 = vector.broadcast %cst_71 : f32 to vector<2x32xf32>
    %215 = arith.subf %214, %213 : vector<2x32xf32>
    %216 = math.exp %215 : vector<2x32xf32>
    %cst_72 = arith.constant 1.000000e+00 : f32
    %217 = vector.broadcast %cst_72 : f32 to vector<2x32xf32>
    %218 = arith.addf %217, %216 : vector<2x32xf32>
    %219 = tpu.reciprocal %218 {approx = true} : vector<2x32xf32> -> vector<2x32xf32>
    %220 = arith.mulf %210, %147 : vector<2x32xf32>
    %221 = arith.mulf %203, %212 : vector<2x32xf32>
    %222 = arith.addf %220, %221 : vector<2x32xf32>
    %223 = math.tanh %222 : vector<2x32xf32>
    %224 = arith.mulf %219, %223 : vector<2x32xf32>
    %225 = arith.truncf %196 : vector<2x32xf32> to vector<2x32xbf16>
    %c2_73 = arith.constant 2 : index
    %c0_74 = arith.constant 0 : index
    %c0_75 = arith.constant 0 : index
    %226 = vector.load %arg4[%c2_73, %c0_74, %c0_75] : memref<8x2x32xbf16, #tpu.memory_space<vmem>>, vector<1x2x32xbf16>
    %227 = vector.shape_cast %226 : vector<1x2x32xbf16> to vector<2x32xbf16>
    %228 = vector.shape_cast %225 : vector<2x32xbf16> to vector<1x2x32xbf16>
    tpu.vector_store %arg4[%c2_73, %c0_74, %c0_75], %228 {strides = array<i32>} : memref<8x2x32xbf16, #tpu.memory_space<vmem>>, vector<1x2x32xbf16>,
    %229 = arith.truncf %224 : vector<2x32xf32> to vector<2x32xbf16>
    %c5_76 = arith.constant 5 : index
    %c0_77 = arith.constant 0 : index
    %c0_78 = arith.constant 0 : index
    %230 = vector.load %arg5[%c5_76, %c0_77, %c0_78] : memref<8x2x32xbf16, #tpu.memory_space<vmem>>, vector<1x2x32xbf16>
    %231 = vector.shape_cast %230 : vector<1x2x32xbf16> to vector<2x32xbf16>
    %232 = vector.shape_cast %229 : vector<2x32xbf16> to vector<1x2x32xbf16>
    tpu.vector_store %arg5[%c5_76, %c0_77, %c0_78], %232 {strides = array<i32>} : memref<8x2x32xbf16, #tpu.memory_space<vmem>>, vector<1x2x32xbf16>,
    %233 = tpu.concatenate %196, %224 in 1 : vector<2x32xf32>, vector<2x32xf32> -> vector<2x64xf32>
    %234 = arith.truncf %233 : vector<2x64xf32> to vector<2x64xbf16>
    %cst_79 = arith.constant dense<0.000000e+00> : vector<2x256xf32>
    %235 = tpu.matmul %234, %3, %cst_79 {dimension_numbers = #tpu.dot_dimension_numbers<[1], [0], [0], [1], [0, 0, 1, 1], [], []>} : vector<2x64xbf16>, vector<64x256xbf16>, vector<2x256xf32> -> vector<2x256xf32>
    %c3 = arith.constant 3 : index
    %c0_80 = arith.constant 0 : index
    %c0_81 = arith.constant 0 : index
    %236 = vector.load %arg1[%c3, %c0_80, %c0_81] : memref<8x2x128xf32, #tpu.memory_space<vmem>>, vector<1x2x128xf32>
    %237 = vector.shape_cast %236 : vector<1x2x128xf32> to vector<2x128xf32>
    %238 = vector.extract_strided_slice %235 {offsets = [0, 0], sizes = [2, 128], strides = [1, 1]} : vector<2x256xf32> to vector<2x128xf32>
    %239 = arith.addf %237, %238 : vector<2x128xf32>
    %c4 = arith.constant 4 : index
    %c0_82 = arith.constant 0 : index
    %c0_83 = arith.constant 0 : index
    %240 = vector.load %arg2[%c4, %c0_82, %c0_83] : memref<8x2x128xf32, #tpu.memory_space<vmem>>, vector<1x2x128xf32>
    %241 = vector.shape_cast %240 : vector<1x2x128xf32> to vector<2x128xf32>
    %242 = vector.extract_strided_slice %235 {offsets = [0, 128], sizes = [2, 128], strides = [1, 1]} : vector<2x256xf32> to vector<2x128xf32>
    %243 = arith.addf %241, %242 : vector<2x128xf32>
    %244 = vector.extract_strided_slice %239 {offsets = [0, 0], sizes = [2, 32], strides = [1, 1]} : vector<2x128xf32> to vector<2x32xf32>
    %cst_84 = arith.constant 0.000000e+00 : f32
    %245 = vector.broadcast %cst_84 : f32 to vector<2x32xf32>
    %246 = arith.subf %245, %244 : vector<2x32xf32>
    %247 = math.exp %246 : vector<2x32xf32>
    %cst_85 = arith.constant 1.000000e+00 : f32
    %248 = vector.broadcast %cst_85 : f32 to vector<2x32xf32>
    %249 = arith.addf %248, %247 : vector<2x32xf32>
    %250 = tpu.reciprocal %249 {approx = true} : vector<2x32xf32> -> vector<2x32xf32>
    %251 = vector.extract_strided_slice %239 {offsets = [0, 32], sizes = [2, 32], strides = [1, 1]} : vector<2x128xf32> to vector<2x32xf32>
    %cst_86 = arith.constant 0.000000e+00 : f32
    %252 = vector.broadcast %cst_86 : f32 to vector<2x32xf32>
    %253 = arith.subf %252, %251 : vector<2x32xf32>
    %254 = math.exp %253 : vector<2x32xf32>
    %cst_87 = arith.constant 1.000000e+00 : f32
    %255 = vector.broadcast %cst_87 : f32 to vector<2x32xf32>
    %256 = arith.addf %255, %254 : vector<2x32xf32>
    %257 = tpu.reciprocal %256 {approx = true} : vector<2x32xf32> -> vector<2x32xf32>
    %258 = vector.extract_strided_slice %239 {offsets = [0, 64], sizes = [2, 32], strides = [1, 1]} : vector<2x128xf32> to vector<2x32xf32>
    %259 = math.tanh %258 : vector<2x32xf32>
    %260 = vector.extract_strided_slice %239 {offsets = [0, 96], sizes = [2, 32], strides = [1, 1]} : vector<2x128xf32> to vector<2x32xf32>
    %cst_88 = arith.constant 0.000000e+00 : f32
    %261 = vector.broadcast %cst_88 : f32 to vector<2x32xf32>
    %262 = arith.subf %261, %260 : vector<2x32xf32>
    %263 = math.exp %262 : vector<2x32xf32>
    %cst_89 = arith.constant 1.000000e+00 : f32
    %264 = vector.broadcast %cst_89 : f32 to vector<2x32xf32>
    %265 = arith.addf %264, %263 : vector<2x32xf32>
    %266 = tpu.reciprocal %265 {approx = true} : vector<2x32xf32> -> vector<2x32xf32>
    %267 = arith.mulf %257, %194 : vector<2x32xf32>
    %268 = arith.mulf %250, %259 : vector<2x32xf32>
    %269 = arith.addf %267, %268 : vector<2x32xf32>
    %270 = math.tanh %269 : vector<2x32xf32>
    %271 = arith.mulf %266, %270 : vector<2x32xf32>
    %272 = vector.extract_strided_slice %243 {offsets = [0, 0], sizes = [2, 32], strides = [1, 1]} : vector<2x128xf32> to vector<2x32xf32>
    %cst_90 = arith.constant 0.000000e+00 : f32
    %273 = vector.broadcast %cst_90 : f32 to vector<2x32xf32>
    %274 = arith.subf %273, %272 : vector<2x32xf32>
    %275 = math.exp %274 : vector<2x32xf32>
    %cst_91 = arith.constant 1.000000e+00 : f32
    %276 = vector.broadcast %cst_91 : f32 to vector<2x32xf32>
    %277 = arith.addf %276, %275 : vector<2x32xf32>
    %278 = tpu.reciprocal %277 {approx = true} : vector<2x32xf32> -> vector<2x32xf32>
    %279 = vector.extract_strided_slice %243 {offsets = [0, 32], sizes = [2, 32], strides = [1, 1]} : vector<2x128xf32> to vector<2x32xf32>
    %cst_92 = arith.constant 0.000000e+00 : f32
    %280 = vector.broadcast %cst_92 : f32 to vector<2x32xf32>
    %281 = arith.subf %280, %279 : vector<2x32xf32>
    %282 = math.exp %281 : vector<2x32xf32>
    %cst_93 = arith.constant 1.000000e+00 : f32
    %283 = vector.broadcast %cst_93 : f32 to vector<2x32xf32>
    %284 = arith.addf %283, %282 : vector<2x32xf32>
    %285 = tpu.reciprocal %284 {approx = true} : vector<2x32xf32> -> vector<2x32xf32>
    %286 = vector.extract_strided_slice %243 {offsets = [0, 64], sizes = [2, 32], strides = [1, 1]} : vector<2x128xf32> to vector<2x32xf32>
    %287 = math.tanh %286 : vector<2x32xf32>
    %288 = vector.extract_strided_slice %243 {offsets = [0, 96], sizes = [2, 32], strides = [1, 1]} : vector<2x128xf32> to vector<2x32xf32>
    %cst_94 = arith.constant 0.000000e+00 : f32
    %289 = vector.broadcast %cst_94 : f32 to vector<2x32xf32>
    %290 = arith.subf %289, %288 : vector<2x32xf32>
    %291 = math.exp %290 : vector<2x32xf32>
    %cst_95 = arith.constant 1.000000e+00 : f32
    %292 = vector.broadcast %cst_95 : f32 to vector<2x32xf32>
    %293 = arith.addf %292, %291 : vector<2x32xf32>
    %294 = tpu.reciprocal %293 {approx = true} : vector<2x32xf32> -> vector<2x32xf32>
    %295 = arith.mulf %285, %222 : vector<2x32xf32>
    %296 = arith.mulf %278, %287 : vector<2x32xf32>
    %297 = arith.addf %295, %296 : vector<2x32xf32>
    %298 = math.tanh %297 : vector<2x32xf32>
    %299 = arith.mulf %294, %298 : vector<2x32xf32>
    %300 = arith.truncf %271 : vector<2x32xf32> to vector<2x32xbf16>
    %c3_96 = arith.constant 3 : index
    %c0_97 = arith.constant 0 : index
    %c0_98 = arith.constant 0 : index
    %301 = vector.load %arg4[%c3_96, %c0_97, %c0_98] : memref<8x2x32xbf16, #tpu.memory_space<vmem>>, vector<1x2x32xbf16>
    %302 = vector.shape_cast %301 : vector<1x2x32xbf16> to vector<2x32xbf16>
    %303 = vector.shape_cast %300 : vector<2x32xbf16> to vector<1x2x32xbf16>
    tpu.vector_store %arg4[%c3_96, %c0_97, %c0_98], %303 {strides = array<i32>} : memref<8x2x32xbf16, #tpu.memory_space<vmem>>, vector<1x2x32xbf16>,
    %304 = arith.truncf %299 : vector<2x32xf32> to vector<2x32xbf16>
    %c4_99 = arith.constant 4 : index
    %c0_100 = arith.constant 0 : index
    %c0_101 = arith.constant 0 : index
    %305 = vector.load %arg5[%c4_99, %c0_100, %c0_101] : memref<8x2x32xbf16, #tpu.memory_space<vmem>>, vector<1x2x32xbf16>
    %306 = vector.shape_cast %305 : vector<1x2x32xbf16> to vector<2x32xbf16>
    %307 = vector.shape_cast %304 : vector<2x32xbf16> to vector<1x2x32xbf16>
    tpu.vector_store %arg5[%c4_99, %c0_100, %c0_101], %307 {strides = array<i32>} : memref<8x2x32xbf16, #tpu.memory_space<vmem>>, vector<1x2x32xbf16>,
    %308 = tpu.concatenate %271, %299 in 1 : vector<2x32xf32>, vector<2x32xf32> -> vector<2x64xf32>
    %309 = arith.truncf %308 : vector<2x64xf32> to vector<2x64xbf16>
    %cst_102 = arith.constant dense<0.000000e+00> : vector<2x256xf32>
    %310 = tpu.matmul %309, %3, %cst_102 {dimension_numbers = #tpu.dot_dimension_numbers<[1], [0], [0], [1], [0, 0, 1, 1], [], []>} : vector<2x64xbf16>, vector<64x256xbf16>, vector<2x256xf32> -> vector<2x256xf32>
    %c4_103 = arith.constant 4 : index
    %c0_104 = arith.constant 0 : index
    %c0_105 = arith.constant 0 : index
    %311 = vector.load %arg1[%c4_103, %c0_104, %c0_105] : memref<8x2x128xf32, #tpu.memory_space<vmem>>, vector<1x2x128xf32>
    %312 = vector.shape_cast %311 : vector<1x2x128xf32> to vector<2x128xf32>
    %313 = vector.extract_strided_slice %310 {offsets = [0, 0], sizes = [2, 128], strides = [1, 1]} : vector<2x256xf32> to vector<2x128xf32>
    %314 = arith.addf %312, %313 : vector<2x128xf32>
    %c3_106 = arith.constant 3 : index
    %c0_107 = arith.constant 0 : index
    %c0_108 = arith.constant 0 : index
    %315 = vector.load %arg2[%c3_106, %c0_107, %c0_108] : memref<8x2x128xf32, #tpu.memory_space<vmem>>, vector<1x2x128xf32>
    %316 = vector.shape_cast %315 : vector<1x2x128xf32> to vector<2x128xf32>
    %317 = vector.extract_strided_slice %310 {offsets = [0, 128], sizes = [2, 128], strides = [1, 1]} : vector<2x256xf32> to vector<2x128xf32>
    %318 = arith.addf %316, %317 : vector<2x128xf32>
    %319 = vector.extract_strided_slice %314 {offsets = [0, 0], sizes = [2, 32], strides = [1, 1]} : vector<2x128xf32> to vector<2x32xf32>
    %cst_109 = arith.constant 0.000000e+00 : f32
    %320 = vector.broadcast %cst_109 : f32 to vector<2x32xf32>
    %321 = arith.subf %320, %319 : vector<2x32xf32>
    %322 = math.exp %321 : vector<2x32xf32>
    %cst_110 = arith.constant 1.000000e+00 : f32
    %323 = vector.broadcast %cst_110 : f32 to vector<2x32xf32>
    %324 = arith.addf %323, %322 : vector<2x32xf32>
    %325 = tpu.reciprocal %324 {approx = true} : vector<2x32xf32> -> vector<2x32xf32>
    %326 = vector.extract_strided_slice %314 {offsets = [0, 32], sizes = [2, 32], strides = [1, 1]} : vector<2x128xf32> to vector<2x32xf32>
    %cst_111 = arith.constant 0.000000e+00 : f32
    %327 = vector.broadcast %cst_111 : f32 to vector<2x32xf32>
    %328 = arith.subf %327, %326 : vector<2x32xf32>
    %329 = math.exp %328 : vector<2x32xf32>
    %cst_112 = arith.constant 1.000000e+00 : f32
    %330 = vector.broadcast %cst_112 : f32 to vector<2x32xf32>
    %331 = arith.addf %330, %329 : vector<2x32xf32>
    %332 = tpu.reciprocal %331 {approx = true} : vector<2x32xf32> -> vector<2x32xf32>
    %333 = vector.extract_strided_slice %314 {offsets = [0, 64], sizes = [2, 32], strides = [1, 1]} : vector<2x128xf32> to vector<2x32xf32>
    %334 = math.tanh %333 : vector<2x32xf32>
    %335 = vector.extract_strided_slice %314 {offsets = [0, 96], sizes = [2, 32], strides = [1, 1]} : vector<2x128xf32> to vector<2x32xf32>
    %cst_113 = arith.constant 0.000000e+00 : f32
    %336 = vector.broadcast %cst_113 : f32 to vector<2x32xf32>
    %337 = arith.subf %336, %335 : vector<2x32xf32>
    %338 = math.exp %337 : vector<2x32xf32>
    %cst_114 = arith.constant 1.000000e+00 : f32
    %339 = vector.broadcast %cst_114 : f32 to vector<2x32xf32>
    %340 = arith.addf %339, %338 : vector<2x32xf32>
    %341 = tpu.reciprocal %340 {approx = true} : vector<2x32xf32> -> vector<2x32xf32>
    %342 = arith.mulf %332, %269 : vector<2x32xf32>
    %343 = arith.mulf %325, %334 : vector<2x32xf32>
    %344 = arith.addf %342, %343 : vector<2x32xf32>
    %345 = math.tanh %344 : vector<2x32xf32>
    %346 = arith.mulf %341, %345 : vector<2x32xf32>
    %347 = vector.extract_strided_slice %318 {offsets = [0, 0], sizes = [2, 32], strides = [1, 1]} : vector<2x128xf32> to vector<2x32xf32>
    %cst_115 = arith.constant 0.000000e+00 : f32
    %348 = vector.broadcast %cst_115 : f32 to vector<2x32xf32>
    %349 = arith.subf %348, %347 : vector<2x32xf32>
    %350 = math.exp %349 : vector<2x32xf32>
    %cst_116 = arith.constant 1.000000e+00 : f32
    %351 = vector.broadcast %cst_116 : f32 to vector<2x32xf32>
    %352 = arith.addf %351, %350 : vector<2x32xf32>
    %353 = tpu.reciprocal %352 {approx = true} : vector<2x32xf32> -> vector<2x32xf32>
    %354 = vector.extract_strided_slice %318 {offsets = [0, 32], sizes = [2, 32], strides = [1, 1]} : vector<2x128xf32> to vector<2x32xf32>
    %cst_117 = arith.constant 0.000000e+00 : f32
    %355 = vector.broadcast %cst_117 : f32 to vector<2x32xf32>
    %356 = arith.subf %355, %354 : vector<2x32xf32>
    %357 = math.exp %356 : vector<2x32xf32>
    %cst_118 = arith.constant 1.000000e+00 : f32
    %358 = vector.broadcast %cst_118 : f32 to vector<2x32xf32>
    %359 = arith.addf %358, %357 : vector<2x32xf32>
    %360 = tpu.reciprocal %359 {approx = true} : vector<2x32xf32> -> vector<2x32xf32>
    %361 = vector.extract_strided_slice %318 {offsets = [0, 64], sizes = [2, 32], strides = [1, 1]} : vector<2x128xf32> to vector<2x32xf32>
    %362 = math.tanh %361 : vector<2x32xf32>
    %363 = vector.extract_strided_slice %318 {offsets = [0, 96], sizes = [2, 32], strides = [1, 1]} : vector<2x128xf32> to vector<2x32xf32>
    %cst_119 = arith.constant 0.000000e+00 : f32
    %364 = vector.broadcast %cst_119 : f32 to vector<2x32xf32>
    %365 = arith.subf %364, %363 : vector<2x32xf32>
    %366 = math.exp %365 : vector<2x32xf32>
    %cst_120 = arith.constant 1.000000e+00 : f32
    %367 = vector.broadcast %cst_120 : f32 to vector<2x32xf32>
    %368 = arith.addf %367, %366 : vector<2x32xf32>
    %369 = tpu.reciprocal %368 {approx = true} : vector<2x32xf32> -> vector<2x32xf32>
    %370 = arith.mulf %360, %297 : vector<2x32xf32>
    %371 = arith.mulf %353, %362 : vector<2x32xf32>
    %372 = arith.addf %370, %371 : vector<2x32xf32>
    %373 = math.tanh %372 : vector<2x32xf32>
    %374 = arith.mulf %369, %373 : vector<2x32xf32>
    %375 = arith.truncf %346 : vector<2x32xf32> to vector<2x32xbf16>
    %c4_121 = arith.constant 4 : index
    %c0_122 = arith.constant 0 : index
    %c0_123 = arith.constant 0 : index
    %376 = vector.load %arg4[%c4_121, %c0_122, %c0_123] : memref<8x2x32xbf16, #tpu.memory_space<vmem>>, vector<1x2x32xbf16>
    %377 = vector.shape_cast %376 : vector<1x2x32xbf16> to vector<2x32xbf16>
    %378 = vector.shape_cast %375 : vector<2x32xbf16> to vector<1x2x32xbf16>
    tpu.vector_store %arg4[%c4_121, %c0_122, %c0_123], %378 {strides = array<i32>} : memref<8x2x32xbf16, #tpu.memory_space<vmem>>, vector<1x2x32xbf16>,
    %379 = arith.truncf %374 : vector<2x32xf32> to vector<2x32xbf16>
    %c3_124 = arith.constant 3 : index
    %c0_125 = arith.constant 0 : index
    %c0_126 = arith.constant 0 : index
    %380 = vector.load %arg5[%c3_124, %c0_125, %c0_126] : memref<8x2x32xbf16, #tpu.memory_space<vmem>>, vector<1x2x32xbf16>
    %381 = vector.shape_cast %380 : vector<1x2x32xbf16> to vector<2x32xbf16>
    %382 = vector.shape_cast %379 : vector<2x32xbf16> to vector<1x2x32xbf16>
    tpu.vector_store %arg5[%c3_124, %c0_125, %c0_126], %382 {strides = array<i32>} : memref<8x2x32xbf16, #tpu.memory_space<vmem>>, vector<1x2x32xbf16>,
    %383 = tpu.concatenate %346, %374 in 1 : vector<2x32xf32>, vector<2x32xf32> -> vector<2x64xf32>
    %384 = arith.truncf %383 : vector<2x64xf32> to vector<2x64xbf16>
    %cst_127 = arith.constant dense<0.000000e+00> : vector<2x256xf32>
    %385 = tpu.matmul %384, %3, %cst_127 {dimension_numbers = #tpu.dot_dimension_numbers<[1], [0], [0], [1], [0, 0, 1, 1], [], []>} : vector<2x64xbf16>, vector<64x256xbf16>, vector<2x256xf32> -> vector<2x256xf32>
    %c5_128 = arith.constant 5 : index
    %c0_129 = arith.constant 0 : index
    %c0_130 = arith.constant 0 : index
    %386 = vector.load %arg1[%c5_128, %c0_129, %c0_130] : memref<8x2x128xf32, #tpu.memory_space<vmem>>, vector<1x2x128xf32>
    %387 = vector.shape_cast %386 : vector<1x2x128xf32> to vector<2x128xf32>
    %388 = vector.extract_strided_slice %385 {offsets = [0, 0], sizes = [2, 128], strides = [1, 1]} : vector<2x256xf32> to vector<2x128xf32>
    %389 = arith.addf %387, %388 : vector<2x128xf32>
    %c2_131 = arith.constant 2 : index
    %c0_132 = arith.constant 0 : index
    %c0_133 = arith.constant 0 : index
    %390 = vector.load %arg2[%c2_131, %c0_132, %c0_133] : memref<8x2x128xf32, #tpu.memory_space<vmem>>, vector<1x2x128xf32>
    %391 = vector.shape_cast %390 : vector<1x2x128xf32> to vector<2x128xf32>
    %392 = vector.extract_strided_slice %385 {offsets = [0, 128], sizes = [2, 128], strides = [1, 1]} : vector<2x256xf32> to vector<2x128xf32>
    %393 = arith.addf %391, %392 : vector<2x128xf32>
    %394 = vector.extract_strided_slice %389 {offsets = [0, 0], sizes = [2, 32], strides = [1, 1]} : vector<2x128xf32> to vector<2x32xf32>
    %cst_134 = arith.constant 0.000000e+00 : f32
    %395 = vector.broadcast %cst_134 : f32 to vector<2x32xf32>
    %396 = arith.subf %395, %394 : vector<2x32xf32>
    %397 = math.exp %396 : vector<2x32xf32>
    %cst_135 = arith.constant 1.000000e+00 : f32
    %398 = vector.broadcast %cst_135 : f32 to vector<2x32xf32>
    %399 = arith.addf %398, %397 : vector<2x32xf32>
    %400 = tpu.reciprocal %399 {approx = true} : vector<2x32xf32> -> vector<2x32xf32>
    %401 = vector.extract_strided_slice %389 {offsets = [0, 32], sizes = [2, 32], strides = [1, 1]} : vector<2x128xf32> to vector<2x32xf32>
    %cst_136 = arith.constant 0.000000e+00 : f32
    %402 = vector.broadcast %cst_136 : f32 to vector<2x32xf32>
    %403 = arith.subf %402, %401 : vector<2x32xf32>
    %404 = math.exp %403 : vector<2x32xf32>
    %cst_137 = arith.constant 1.000000e+00 : f32
    %405 = vector.broadcast %cst_137 : f32 to vector<2x32xf32>
    %406 = arith.addf %405, %404 : vector<2x32xf32>
    %407 = tpu.reciprocal %406 {approx = true} : vector<2x32xf32> -> vector<2x32xf32>
    %408 = vector.extract_strided_slice %389 {offsets = [0, 64], sizes = [2, 32], strides = [1, 1]} : vector<2x128xf32> to vector<2x32xf32>
    %409 = math.tanh %408 : vector<2x32xf32>
    %410 = vector.extract_strided_slice %389 {offsets = [0, 96], sizes = [2, 32], strides = [1, 1]} : vector<2x128xf32> to vector<2x32xf32>
    %cst_138 = arith.constant 0.000000e+00 : f32
    %411 = vector.broadcast %cst_138 : f32 to vector<2x32xf32>
    %412 = arith.subf %411, %410 : vector<2x32xf32>
    %413 = math.exp %412 : vector<2x32xf32>
    %cst_139 = arith.constant 1.000000e+00 : f32
    %414 = vector.broadcast %cst_139 : f32 to vector<2x32xf32>
    %415 = arith.addf %414, %413 : vector<2x32xf32>
    %416 = tpu.reciprocal %415 {approx = true} : vector<2x32xf32> -> vector<2x32xf32>
    %417 = arith.mulf %407, %344 : vector<2x32xf32>
    %418 = arith.mulf %400, %409 : vector<2x32xf32>
    %419 = arith.addf %417, %418 : vector<2x32xf32>
    %420 = math.tanh %419 : vector<2x32xf32>
    %421 = arith.mulf %416, %420 : vector<2x32xf32>
    %422 = vector.extract_strided_slice %393 {offsets = [0, 0], sizes = [2, 32], strides = [1, 1]} : vector<2x128xf32> to vector<2x32xf32>
    %cst_140 = arith.constant 0.000000e+00 : f32
    %423 = vector.broadcast %cst_140 : f32 to vector<2x32xf32>
    %424 = arith.subf %423, %422 : vector<2x32xf32>
    %425 = math.exp %424 : vector<2x32xf32>
    %cst_141 = arith.constant 1.000000e+00 : f32
    %426 = vector.broadcast %cst_141 : f32 to vector<2x32xf32>
    %427 = arith.addf %426, %425 : vector<2x32xf32>
    %428 = tpu.reciprocal %427 {approx = true} : vector<2x32xf32> -> vector<2x32xf32>
    %429 = vector.extract_strided_slice %393 {offsets = [0, 32], sizes = [2, 32], strides = [1, 1]} : vector<2x128xf32> to vector<2x32xf32>
    %cst_142 = arith.constant 0.000000e+00 : f32
    %430 = vector.broadcast %cst_142 : f32 to vector<2x32xf32>
    %431 = arith.subf %430, %429 : vector<2x32xf32>
    %432 = math.exp %431 : vector<2x32xf32>
    %cst_143 = arith.constant 1.000000e+00 : f32
    %433 = vector.broadcast %cst_143 : f32 to vector<2x32xf32>
    %434 = arith.addf %433, %432 : vector<2x32xf32>
    %435 = tpu.reciprocal %434 {approx = true} : vector<2x32xf32> -> vector<2x32xf32>
    %436 = vector.extract_strided_slice %393 {offsets = [0, 64], sizes = [2, 32], strides = [1, 1]} : vector<2x128xf32> to vector<2x32xf32>
    %437 = math.tanh %436 : vector<2x32xf32>
    %438 = vector.extract_strided_slice %393 {offsets = [0, 96], sizes = [2, 32], strides = [1, 1]} : vector<2x128xf32> to vector<2x32xf32>
    %cst_144 = arith.constant 0.000000e+00 : f32
    %439 = vector.broadcast %cst_144 : f32 to vector<2x32xf32>
    %440 = arith.subf %439, %438 : vector<2x32xf32>
    %441 = math.exp %440 : vector<2x32xf32>
    %cst_145 = arith.constant 1.000000e+00 : f32
    %442 = vector.broadcast %cst_145 : f32 to vector<2x32xf32>
    %443 = arith.addf %442, %441 : vector<2x32xf32>
    %444 = tpu.reciprocal %443 {approx = true} : vector<2x32xf32> -> vector<2x32xf32>
    %445 = arith.mulf %435, %372 : vector<2x32xf32>
    %446 = arith.mulf %428, %437 : vector<2x32xf32>
    %447 = arith.addf %445, %446 : vector<2x32xf32>
    %448 = math.tanh %447 : vector<2x32xf32>
    %449 = arith.mulf %444, %448 : vector<2x32xf32>
    %450 = arith.truncf %421 : vector<2x32xf32> to vector<2x32xbf16>
    %c5_146 = arith.constant 5 : index
    %c0_147 = arith.constant 0 : index
    %c0_148 = arith.constant 0 : index
    %451 = vector.load %arg4[%c5_146, %c0_147, %c0_148] : memref<8x2x32xbf16, #tpu.memory_space<vmem>>, vector<1x2x32xbf16>
    %452 = vector.shape_cast %451 : vector<1x2x32xbf16> to vector<2x32xbf16>
    %453 = vector.shape_cast %450 : vector<2x32xbf16> to vector<1x2x32xbf16>
    tpu.vector_store %arg4[%c5_146, %c0_147, %c0_148], %453 {strides = array<i32>} : memref<8x2x32xbf16, #tpu.memory_space<vmem>>, vector<1x2x32xbf16>,
    %454 = arith.truncf %449 : vector<2x32xf32> to vector<2x32xbf16>
    %c2_149 = arith.constant 2 : index
    %c0_150 = arith.constant 0 : index
    %c0_151 = arith.constant 0 : index
    %455 = vector.load %arg5[%c2_149, %c0_150, %c0_151] : memref<8x2x32xbf16, #tpu.memory_space<vmem>>, vector<1x2x32xbf16>
    %456 = vector.shape_cast %455 : vector<1x2x32xbf16> to vector<2x32xbf16>
    %457 = vector.shape_cast %454 : vector<2x32xbf16> to vector<1x2x32xbf16>
    tpu.vector_store %arg5[%c2_149, %c0_150, %c0_151], %457 {strides = array<i32>} : memref<8x2x32xbf16, #tpu.memory_space<vmem>>, vector<1x2x32xbf16>,
    %458 = tpu.concatenate %421, %449 in 1 : vector<2x32xf32>, vector<2x32xf32> -> vector<2x64xf32>
    %459 = arith.truncf %458 : vector<2x64xf32> to vector<2x64xbf16>
    %cst_152 = arith.constant dense<0.000000e+00> : vector<2x256xf32>
    %460 = tpu.matmul %459, %3, %cst_152 {dimension_numbers = #tpu.dot_dimension_numbers<[1], [0], [0], [1], [0, 0, 1, 1], [], []>} : vector<2x64xbf16>, vector<64x256xbf16>, vector<2x256xf32> -> vector<2x256xf32>
    %c6_153 = arith.constant 6 : index
    %c0_154 = arith.constant 0 : index
    %c0_155 = arith.constant 0 : index
    %461 = vector.load %arg1[%c6_153, %c0_154, %c0_155] : memref<8x2x128xf32, #tpu.memory_space<vmem>>, vector<1x2x128xf32>
    %462 = vector.shape_cast %461 : vector<1x2x128xf32> to vector<2x128xf32>
    %463 = vector.extract_strided_slice %460 {offsets = [0, 0], sizes = [2, 128], strides = [1, 1]} : vector<2x256xf32> to vector<2x128xf32>
    %464 = arith.addf %462, %463 : vector<2x128xf32>
    %c1_156 = arith.constant 1 : index
    %c0_157 = arith.constant 0 : index
    %c0_158 = arith.constant 0 : index
    %465 = vector.load %arg2[%c1_156, %c0_157, %c0_158] : memref<8x2x128xf32, #tpu.memory_space<vmem>>, vector<1x2x128xf32>
    %466 = vector.shape_cast %465 : vector<1x2x128xf32> to vector<2x128xf32>
    %467 = vector.extract_strided_slice %460 {offsets = [0, 128], sizes = [2, 128], strides = [1, 1]} : vector<2x256xf32> to vector<2x128xf32>
    %468 = arith.addf %466, %467 : vector<2x128xf32>
    %469 = vector.extract_strided_slice %464 {offsets = [0, 0], sizes = [2, 32], strides = [1, 1]} : vector<2x128xf32> to vector<2x32xf32>
    %cst_159 = arith.constant 0.000000e+00 : f32
    %470 = vector.broadcast %cst_159 : f32 to vector<2x32xf32>
    %471 = arith.subf %470, %469 : vector<2x32xf32>
    %472 = math.exp %471 : vector<2x32xf32>
    %cst_160 = arith.constant 1.000000e+00 : f32
    %473 = vector.broadcast %cst_160 : f32 to vector<2x32xf32>
    %474 = arith.addf %473, %472 : vector<2x32xf32>
    %475 = tpu.reciprocal %474 {approx = true} : vector<2x32xf32> -> vector<2x32xf32>
    %476 = vector.extract_strided_slice %464 {offsets = [0, 32], sizes = [2, 32], strides = [1, 1]} : vector<2x128xf32> to vector<2x32xf32>
    %cst_161 = arith.constant 0.000000e+00 : f32
    %477 = vector.broadcast %cst_161 : f32 to vector<2x32xf32>
    %478 = arith.subf %477, %476 : vector<2x32xf32>
    %479 = math.exp %478 : vector<2x32xf32>
    %cst_162 = arith.constant 1.000000e+00 : f32
    %480 = vector.broadcast %cst_162 : f32 to vector<2x32xf32>
    %481 = arith.addf %480, %479 : vector<2x32xf32>
    %482 = tpu.reciprocal %481 {approx = true} : vector<2x32xf32> -> vector<2x32xf32>
    %483 = vector.extract_strided_slice %464 {offsets = [0, 64], sizes = [2, 32], strides = [1, 1]} : vector<2x128xf32> to vector<2x32xf32>
    %484 = math.tanh %483 : vector<2x32xf32>
    %485 = vector.extract_strided_slice %464 {offsets = [0, 96], sizes = [2, 32], strides = [1, 1]} : vector<2x128xf32> to vector<2x32xf32>
    %cst_163 = arith.constant 0.000000e+00 : f32
    %486 = vector.broadcast %cst_163 : f32 to vector<2x32xf32>
    %487 = arith.subf %486, %485 : vector<2x32xf32>
    %488 = math.exp %487 : vector<2x32xf32>
    %cst_164 = arith.constant 1.000000e+00 : f32
    %489 = vector.broadcast %cst_164 : f32 to vector<2x32xf32>
    %490 = arith.addf %489, %488 : vector<2x32xf32>
    %491 = tpu.reciprocal %490 {approx = true} : vector<2x32xf32> -> vector<2x32xf32>
    %492 = arith.mulf %482, %419 : vector<2x32xf32>
    %493 = arith.mulf %475, %484 : vector<2x32xf32>
    %494 = arith.addf %492, %493 : vector<2x32xf32>
    %495 = math.tanh %494 : vector<2x32xf32>
    %496 = arith.mulf %491, %495 : vector<2x32xf32>
    %497 = vector.extract_strided_slice %468 {offsets = [0, 0], sizes = [2, 32], strides = [1, 1]} : vector<2x128xf32> to vector<2x32xf32>
    %cst_165 = arith.constant 0.000000e+00 : f32
    %498 = vector.broadcast %cst_165 : f32 to vector<2x32xf32>
    %499 = arith.subf %498, %497 : vector<2x32xf32>
    %500 = math.exp %499 : vector<2x32xf32>
    %cst_166 = arith.constant 1.000000e+00 : f32
    %501 = vector.broadcast %cst_166 : f32 to vector<2x32xf32>
    %502 = arith.addf %501, %500 : vector<2x32xf32>
    %503 = tpu.reciprocal %502 {approx = true} : vector<2x32xf32> -> vector<2x32xf32>
    %504 = vector.extract_strided_slice %468 {offsets = [0, 32], sizes = [2, 32], strides = [1, 1]} : vector<2x128xf32> to vector<2x32xf32>
    %cst_167 = arith.constant 0.000000e+00 : f32
    %505 = vector.broadcast %cst_167 : f32 to vector<2x32xf32>
    %506 = arith.subf %505, %504 : vector<2x32xf32>
    %507 = math.exp %506 : vector<2x32xf32>
    %cst_168 = arith.constant 1.000000e+00 : f32
    %508 = vector.broadcast %cst_168 : f32 to vector<2x32xf32>
    %509 = arith.addf %508, %507 : vector<2x32xf32>
    %510 = tpu.reciprocal %509 {approx = true} : vector<2x32xf32> -> vector<2x32xf32>
    %511 = vector.extract_strided_slice %468 {offsets = [0, 64], sizes = [2, 32], strides = [1, 1]} : vector<2x128xf32> to vector<2x32xf32>
    %512 = math.tanh %511 : vector<2x32xf32>
    %513 = vector.extract_strided_slice %468 {offsets = [0, 96], sizes = [2, 32], strides = [1, 1]} : vector<2x128xf32> to vector<2x32xf32>
    %cst_169 = arith.constant 0.000000e+00 : f32
    %514 = vector.broadcast %cst_169 : f32 to vector<2x32xf32>
    %515 = arith.subf %514, %513 : vector<2x32xf32>
    %516 = math.exp %515 : vector<2x32xf32>
    %cst_170 = arith.constant 1.000000e+00 : f32
    %517 = vector.broadcast %cst_170 : f32 to vector<2x32xf32>
    %518 = arith.addf %517, %516 : vector<2x32xf32>
    %519 = tpu.reciprocal %518 {approx = true} : vector<2x32xf32> -> vector<2x32xf32>
    %520 = arith.mulf %510, %447 : vector<2x32xf32>
    %521 = arith.mulf %503, %512 : vector<2x32xf32>
    %522 = arith.addf %520, %521 : vector<2x32xf32>
    %523 = math.tanh %522 : vector<2x32xf32>
    %524 = arith.mulf %519, %523 : vector<2x32xf32>
    %525 = arith.truncf %496 : vector<2x32xf32> to vector<2x32xbf16>
    %c6_171 = arith.constant 6 : index
    %c0_172 = arith.constant 0 : index
    %c0_173 = arith.constant 0 : index
    %526 = vector.load %arg4[%c6_171, %c0_172, %c0_173] : memref<8x2x32xbf16, #tpu.memory_space<vmem>>, vector<1x2x32xbf16>
    %527 = vector.shape_cast %526 : vector<1x2x32xbf16> to vector<2x32xbf16>
    %528 = vector.shape_cast %525 : vector<2x32xbf16> to vector<1x2x32xbf16>
    tpu.vector_store %arg4[%c6_171, %c0_172, %c0_173], %528 {strides = array<i32>} : memref<8x2x32xbf16, #tpu.memory_space<vmem>>, vector<1x2x32xbf16>,
    %529 = arith.truncf %524 : vector<2x32xf32> to vector<2x32xbf16>
    %c1_174 = arith.constant 1 : index
    %c0_175 = arith.constant 0 : index
    %c0_176 = arith.constant 0 : index
    %530 = vector.load %arg5[%c1_174, %c0_175, %c0_176] : memref<8x2x32xbf16, #tpu.memory_space<vmem>>, vector<1x2x32xbf16>
    %531 = vector.shape_cast %530 : vector<1x2x32xbf16> to vector<2x32xbf16>
    %532 = vector.shape_cast %529 : vector<2x32xbf16> to vector<1x2x32xbf16>
    tpu.vector_store %arg5[%c1_174, %c0_175, %c0_176], %532 {strides = array<i32>} : memref<8x2x32xbf16, #tpu.memory_space<vmem>>, vector<1x2x32xbf16>,
    %533 = tpu.concatenate %496, %524 in 1 : vector<2x32xf32>, vector<2x32xf32> -> vector<2x64xf32>
    %534 = arith.truncf %533 : vector<2x64xf32> to vector<2x64xbf16>
    %cst_177 = arith.constant dense<0.000000e+00> : vector<2x256xf32>
    %535 = tpu.matmul %534, %3, %cst_177 {dimension_numbers = #tpu.dot_dimension_numbers<[1], [0], [0], [1], [0, 0, 1, 1], [], []>} : vector<2x64xbf16>, vector<64x256xbf16>, vector<2x256xf32> -> vector<2x256xf32>
    %c7_178 = arith.constant 7 : index
    %c0_179 = arith.constant 0 : index
    %c0_180 = arith.constant 0 : index
    %536 = vector.load %arg1[%c7_178, %c0_179, %c0_180] : memref<8x2x128xf32, #tpu.memory_space<vmem>>, vector<1x2x128xf32>
    %537 = vector.shape_cast %536 : vector<1x2x128xf32> to vector<2x128xf32>
    %538 = vector.extract_strided_slice %535 {offsets = [0, 0], sizes = [2, 128], strides = [1, 1]} : vector<2x256xf32> to vector<2x128xf32>
    %539 = arith.addf %537, %538 : vector<2x128xf32>
    %c0_181 = arith.constant 0 : index
    %c0_182 = arith.constant 0 : index
    %c0_183 = arith.constant 0 : index
    %540 = vector.load %arg2[%c0_181, %c0_182, %c0_183] : memref<8x2x128xf32, #tpu.memory_space<vmem>>, vector<1x2x128xf32>
    %541 = vector.shape_cast %540 : vector<1x2x128xf32> to vector<2x128xf32>
    %542 = vector.extract_strided_slice %535 {offsets = [0, 128], sizes = [2, 128], strides = [1, 1]} : vector<2x256xf32> to vector<2x128xf32>
    %543 = arith.addf %541, %542 : vector<2x128xf32>
    %544 = vector.extract_strided_slice %539 {offsets = [0, 0], sizes = [2, 32], strides = [1, 1]} : vector<2x128xf32> to vector<2x32xf32>
    %cst_184 = arith.constant 0.000000e+00 : f32
    %545 = vector.broadcast %cst_184 : f32 to vector<2x32xf32>
    %546 = arith.subf %545, %544 : vector<2x32xf32>
    %547 = math.exp %546 : vector<2x32xf32>
    %cst_185 = arith.constant 1.000000e+00 : f32
    %548 = vector.broadcast %cst_185 : f32 to vector<2x32xf32>
    %549 = arith.addf %548, %547 : vector<2x32xf32>
    %550 = tpu.reciprocal %549 {approx = true} : vector<2x32xf32> -> vector<2x32xf32>
    %551 = vector.extract_strided_slice %539 {offsets = [0, 32], sizes = [2, 32], strides = [1, 1]} : vector<2x128xf32> to vector<2x32xf32>
    %cst_186 = arith.constant 0.000000e+00 : f32
    %552 = vector.broadcast %cst_186 : f32 to vector<2x32xf32>
    %553 = arith.subf %552, %551 : vector<2x32xf32>
    %554 = math.exp %553 : vector<2x32xf32>
    %cst_187 = arith.constant 1.000000e+00 : f32
    %555 = vector.broadcast %cst_187 : f32 to vector<2x32xf32>
    %556 = arith.addf %555, %554 : vector<2x32xf32>
    %557 = tpu.reciprocal %556 {approx = true} : vector<2x32xf32> -> vector<2x32xf32>
    %558 = vector.extract_strided_slice %539 {offsets = [0, 64], sizes = [2, 32], strides = [1, 1]} : vector<2x128xf32> to vector<2x32xf32>
    %559 = math.tanh %558 : vector<2x32xf32>
    %560 = vector.extract_strided_slice %539 {offsets = [0, 96], sizes = [2, 32], strides = [1, 1]} : vector<2x128xf32> to vector<2x32xf32>
    %cst_188 = arith.constant 0.000000e+00 : f32
    %561 = vector.broadcast %cst_188 : f32 to vector<2x32xf32>
    %562 = arith.subf %561, %560 : vector<2x32xf32>
    %563 = math.exp %562 : vector<2x32xf32>
    %cst_189 = arith.constant 1.000000e+00 : f32
    %564 = vector.broadcast %cst_189 : f32 to vector<2x32xf32>
    %565 = arith.addf %564, %563 : vector<2x32xf32>
    %566 = tpu.reciprocal %565 {approx = true} : vector<2x32xf32> -> vector<2x32xf32>
    %567 = arith.mulf %557, %494 : vector<2x32xf32>
    %568 = arith.mulf %550, %559 : vector<2x32xf32>
    %569 = arith.addf %567, %568 : vector<2x32xf32>
    %570 = math.tanh %569 : vector<2x32xf32>
    %571 = arith.mulf %566, %570 : vector<2x32xf32>
    %572 = vector.extract_strided_slice %543 {offsets = [0, 0], sizes = [2, 32], strides = [1, 1]} : vector<2x128xf32> to vector<2x32xf32>
    %cst_190 = arith.constant 0.000000e+00 : f32
    %573 = vector.broadcast %cst_190 : f32 to vector<2x32xf32>
    %574 = arith.subf %573, %572 : vector<2x32xf32>
    %575 = math.exp %574 : vector<2x32xf32>
    %cst_191 = arith.constant 1.000000e+00 : f32
    %576 = vector.broadcast %cst_191 : f32 to vector<2x32xf32>
    %577 = arith.addf %576, %575 : vector<2x32xf32>
    %578 = tpu.reciprocal %577 {approx = true} : vector<2x32xf32> -> vector<2x32xf32>
    %579 = vector.extract_strided_slice %543 {offsets = [0, 32], sizes = [2, 32], strides = [1, 1]} : vector<2x128xf32> to vector<2x32xf32>
    %cst_192 = arith.constant 0.000000e+00 : f32
    %580 = vector.broadcast %cst_192 : f32 to vector<2x32xf32>
    %581 = arith.subf %580, %579 : vector<2x32xf32>
    %582 = math.exp %581 : vector<2x32xf32>
    %cst_193 = arith.constant 1.000000e+00 : f32
    %583 = vector.broadcast %cst_193 : f32 to vector<2x32xf32>
    %584 = arith.addf %583, %582 : vector<2x32xf32>
    %585 = tpu.reciprocal %584 {approx = true} : vector<2x32xf32> -> vector<2x32xf32>
    %586 = vector.extract_strided_slice %543 {offsets = [0, 64], sizes = [2, 32], strides = [1, 1]} : vector<2x128xf32> to vector<2x32xf32>
    %587 = math.tanh %586 : vector<2x32xf32>
    %588 = vector.extract_strided_slice %543 {offsets = [0, 96], sizes = [2, 32], strides = [1, 1]} : vector<2x128xf32> to vector<2x32xf32>
    %cst_194 = arith.constant 0.000000e+00 : f32
    %589 = vector.broadcast %cst_194 : f32 to vector<2x32xf32>
    %590 = arith.subf %589, %588 : vector<2x32xf32>
    %591 = math.exp %590 : vector<2x32xf32>
    %cst_195 = arith.constant 1.000000e+00 : f32
    %592 = vector.broadcast %cst_195 : f32 to vector<2x32xf32>
    %593 = arith.addf %592, %591 : vector<2x32xf32>
    %594 = tpu.reciprocal %593 {approx = true} : vector<2x32xf32> -> vector<2x32xf32>
    %595 = arith.mulf %585, %522 : vector<2x32xf32>
    %596 = arith.mulf %578, %587 : vector<2x32xf32>
    %597 = arith.addf %595, %596 : vector<2x32xf32>
    %598 = math.tanh %597 : vector<2x32xf32>
    %599 = arith.mulf %594, %598 : vector<2x32xf32>
    %600 = arith.truncf %571 : vector<2x32xf32> to vector<2x32xbf16>
    %c7_196 = arith.constant 7 : index
    %c0_197 = arith.constant 0 : index
    %c0_198 = arith.constant 0 : index
    %601 = vector.load %arg4[%c7_196, %c0_197, %c0_198] : memref<8x2x32xbf16, #tpu.memory_space<vmem>>, vector<1x2x32xbf16>
    %602 = vector.shape_cast %601 : vector<1x2x32xbf16> to vector<2x32xbf16>
    %603 = vector.shape_cast %600 : vector<2x32xbf16> to vector<1x2x32xbf16>
    tpu.vector_store %arg4[%c7_196, %c0_197, %c0_198], %603 {strides = array<i32>} : memref<8x2x32xbf16, #tpu.memory_space<vmem>>, vector<1x2x32xbf16>,
    %604 = arith.truncf %599 : vector<2x32xf32> to vector<2x32xbf16>
    %c0_199 = arith.constant 0 : index
    %c0_200 = arith.constant 0 : index
    %c0_201 = arith.constant 0 : index
    %605 = vector.load %arg5[%c0_199, %c0_200, %c0_201] : memref<8x2x32xbf16, #tpu.memory_space<vmem>>, vector<1x2x32xbf16>
    %606 = vector.shape_cast %605 : vector<1x2x32xbf16> to vector<2x32xbf16>
    %607 = vector.shape_cast %604 : vector<2x32xbf16> to vector<1x2x32xbf16>
    tpu.vector_store %arg5[%c0_199, %c0_200, %c0_201], %607 {strides = array<i32>} : memref<8x2x32xbf16, #tpu.memory_space<vmem>>, vector<1x2x32xbf16>,
    %c0_202 = arith.constant 0 : index
    %c0_203 = arith.constant 0 : index
    %608 = vector.load %arg6[%c0_202, %c0_203] : memref<2x32xf32, #tpu.memory_space<vmem>>, vector<2x32xf32>
    tpu.vector_store %arg6[%c0_202, %c0_203], %571 {strides = array<i32>} : memref<2x32xf32, #tpu.memory_space<vmem>>, vector<2x32xf32>,
    %c0_204 = arith.constant 0 : index
    %c0_205 = arith.constant 0 : index
    %609 = vector.load %arg7[%c0_204, %c0_205] : memref<2x32xf32, #tpu.memory_space<vmem>>, vector<2x32xf32>
    tpu.vector_store %arg7[%c0_204, %c0_205], %569 {strides = array<i32>} : memref<2x32xf32, #tpu.memory_space<vmem>>, vector<2x32xf32>,
    %c0_206 = arith.constant 0 : index
    %c0_207 = arith.constant 0 : index
    %610 = vector.load %arg8[%c0_206, %c0_207] : memref<2x32xf32, #tpu.memory_space<vmem>>, vector<2x32xf32>
    tpu.vector_store %arg8[%c0_206, %c0_207], %599 {strides = array<i32>} : memref<2x32xf32, #tpu.memory_space<vmem>>, vector<2x32xf32>,
    %c0_208 = arith.constant 0 : index
    %c0_209 = arith.constant 0 : index
    %611 = vector.load %arg9[%c0_208, %c0_209] : memref<2x32xf32, #tpu.memory_space<vmem>>, vector<2x32xf32>
    tpu.vector_store %arg9[%c0_208, %c0_209], %597 {strides = array<i32>} : memref<2x32xf32, #tpu.memory_space<vmem>>, vector<2x32xf32>,
    return
  }
  func.func @transform_0(%arg0: i32) -> (i32, i32, i32) {
    %c0_i32 = arith.constant 0 : i32
    %c0_i32_0 = arith.constant 0 : i32
    %c0_i32_1 = arith.constant 0 : i32
    return %arg0, %c0_i32, %c0_i32_0 : i32, i32, i32
  }
  func.func @transform_1(%arg0: i32) -> (i32, i32, i32) {
    %c0_i32 = arith.constant 0 : i32
    %0 = arith.subi %c0_i32, %arg0 : i32
    %c0_i32_0 = arith.constant 0 : i32
    %c1_i32 = arith.constant 1 : i32
    %c0_i32_1 = arith.constant 0 : i32
    return %0, %c0_i32_0, %c1_i32 : i32, i32, i32
  }
  func.func @transform_2(%arg0: i32) -> (i32, i32) {
    %c0_i32 = arith.constant 0 : i32
    %c0_i32_0 = arith.constant 0 : i32
    %c0_i32_1 = arith.constant 0 : i32
    return %c0_i32, %c0_i32_0 : i32, i32
  }
  func.func @transform_3(%arg0: i32) -> (i32, i32, i32) {
    %c0_i32 = arith.constant 0 : i32
    %c0_i32_0 = arith.constant 0 : i32
    %c0_i32_1 = arith.constant 0 : i32
    return %arg0, %c0_i32, %c0_i32_0 : i32, i32, i32
  }
  func.func @transform_4(%arg0: i32) -> (i32, i32, i32) {
    %c0_i32 = arith.constant 0 : i32
    %0 = arith.subi %c0_i32, %arg0 : i32
    %c0_i32_0 = arith.constant 0 : i32
    %c0_i32_1 = arith.constant 0 : i32
    %c0_i32_2 = arith.constant 0 : i32
    return %0, %c0_i32_0, %c0_i32_1 : i32, i32, i32
  }
}

</mosaic_0001>

<bundles_post_ra>
// kernel: blstm_forward.5
= control target key start
LH: loop header
LB: loop body
LE: loop exit
PB: predicated region body
PF: predicated region fallthrough
CT: control target
= control target key end

     0   :  { %v110_v1 = vmov 0   ;;  %vm46_vm0 = vcmask 130048   ;;  %v21_v4 = vlaneseq  ;;  %s155_s1 = inlined_call_operand.vmem [shape: bf16[16,256], index: 1, kind: input, shape index: {}]   ;;  %s156_s0 = inlined_call_operand.vmem [shape: bf16[16,16], index: 0, kind: input, shape index: {}]   ;;  %s157_s2 = inlined_call_operand.vmem [shape: f32[1,256], index: 2, kind: input, shape index: {}]   ;;  %s158_s3 = inlined_call_operand.vmem [shape: f32[16,256], index: 3, kind: output, shape index: {}]  }
   0x1   :  { %v106_v0 = vld [vmem:[%s155_s1 + $0x4] ss:$8 sps:$4 sm:$0xff]   ;;  %82 = vmatprep.mubr.bf16.mxu0 %v110_v1  ;;  %v108_v2 = vld [vmem:[%s155_s1] ss:$8 sps:$4 sm:$0xff]  }
   0x2   :  { %64 = vmatprep.subr.bf16.mxu0 %v106_v0  ;;  %v109_v3 = vld [vmem:[%s156_s0] sm:$0xff]   ;;  %v22_v5 = vshrl.u32 %v21_v4, 7 }
   0x3   :  { %65 = vmatpush1.bf16.msra.mxu0 %v108_v2  ;;  %v19_v7 = vld [vmem:[%s157_s2] sm:$0x3] }
   0x4   :  { %v23_v6 = vsub.s32 0, %v22_v5  ;;  %v27_v8 = vsub.s32 1, %v22_v5 }
   0x6   :  { %104 = vmatmul.mubr.msk.bf16.vlgmr.msra.gmra.mxu0 %vm46_vm0, %v109_v3  ;;  %v24_v9 = vrot.slane %v19_v7, %v23_v6  ;;  %v28_v10 = vrot.slane %v19_v7, %v27_v8 }
  0xc6   :  { %v84_v11 = vpop.f32.mrf.mxu0 }
  0xc7   :  { %v85_v12 = vadd.f32 %v84_v11, %v24_v9 }
  0xc8   :  { %v86_v13 = vpop.f32.mrf.mxu0 }
  0xc9   :  { %93 = vst [vmem:[%s158_s3] sm:$0xff] %v85_v12  ;;  %v87_v14 = vadd.f32 %v86_v13, %v28_v10 }
  0xca   :  { %v88_v15 = vpop.f32.mrf.mxu0 }
  0xcb   :  { %94 = vst [vmem:[%s158_s3 + $0x8] sm:$0xff] %v87_v14  ;;  %v89_v16 = vadd.f32 %v88_v15, %v24_v9 }
  0xcc   :  { %v90_v17 = vpop.f32.mrf.mxu0 }
  0xcd   :  { %95 = vst [vmem:[%s158_s3 + $0x10] sm:$0xff] %v89_v16  ;;  %v91_v18 = vadd.f32 %v90_v17, %v28_v10 }
  0xcf   :  { %96 = vst [vmem:[%s158_s3 + $0x18] sm:$0xff] %v91_v18 }

// kernel: blstm_forward.7
= control target key start
LH: loop header
LB: loop body
LE: loop exit
PB: predicated region body
PF: predicated region fallthrough
CT: control target
= control target key end

     0   :  { %v227_v1 = vmov 0   ;;  %vm58_vm0 = vcmask 261120   ;;  %v178_v11 = vlaneseq  ;;  %s303_s3 = inlined_call_operand.vmem [shape: bf16[32,256], index: 3, kind: input, shape index: {}]   ;;  %s304_s2 = inlined_call_operand.vmem [shape: bf16[32,256], index: 2, kind: input, shape index: {}]   ;;  %s305_s1 = inlined_call_operand.vmem [shape: bf16[16,32], index: 1, kind: input, shape index: {}]   ;;  %s306_s0 = inlined_call_operand.vmem [shape: bf16[16,32], index: 0, kind: input, shape index: {}]   ;;  %s307_s4 = inlined_call_operand.vmem [shape: f32[1,256], index: 4, kind: input, shape index: {}]   ;;  %s308_s5 = inlined_call_operand.vmem [shape: f32[16,256], index: 5, kind: output, shape index: {}]  }
   0x1   :  { %v213_v0 = vld [vmem:[%s303_s3 + $0x14] ss:$8 sps:$4 sm:$0xff]   ;;  %94 = vmatprep.mubr.bf16.mxu0 %v227_v1  ;;  %165 = vmatprep.mubr.bf16.mxu1 %v227_v1  ;;  %v217_v3 = vld [vmem:[%s303_s3 + $0x10] ss:$8 sps:$4 sm:$0xff]   ;;  %v219_v5 = vld [vmem:[%s303_s3 + $0x4] ss:$8 sps:$4 sm:$0xff]  }
   0x2   :  { %v215_v2 = vld [vmem:[%s304_s2 + $0x14] ss:$8 sps:$4 sm:$0xff]   ;;  %74 = vmatprep.subr.bf16.mxu0 %v213_v0  ;;  %v218_v4 = vld [vmem:[%s304_s2 + $0x10] ss:$8 sps:$4 sm:$0xff]   ;;  %v221_v6 = vld [vmem:[%s304_s2 + $0x4] ss:$8 sps:$4 sm:$0xff]  }
   0x3   :  { %145 = vmatprep.subr.bf16.mxu1 %v215_v2  ;;  %75 = vmatpush1.bf16.msra.mxu0 %v217_v3  ;;  %v223_v7 = vld [vmem:[%s303_s3] ss:$8 sps:$4 sm:$0xff]   ;;  %v179_v12 = vshrl.u32 %v178_v11, 7 }
   0x4   :  { %146 = vmatpush1.bf16.msra.mxu1 %v218_v4  ;;  %76 = vmatprep.subr.bf16.mxu0 %v219_v5  ;;  %v224_v8 = vld [vmem:[%s304_s2] ss:$8 sps:$4 sm:$0xff]  }
   0x5   :  { %147 = vmatprep.subr.bf16.mxu1 %v221_v6  ;;  %v225_v9 = vld [vmem:[%s305_s1] sm:$0xff]   ;;  %v180_v13 = vsub.s32 0, %v179_v12  ;;  %v184_v15 = vsub.s32 1, %v179_v12 }
   0x6   :  { %v226_v10 = vld [vmem:[%s306_s0] sm:$0xff]  }
   0x7   :  { %77 = vmatpush1.bf16.msra.mxu0 %v223_v7  ;;  %v176_v14 = vld [vmem:[%s307_s4] sm:$0x3] }
   0x8   :  { %148 = vmatpush1.bf16.msra.mxu1 %v224_v8  ;;  %v181_v16 = vrot.slane %v176_v14, %v180_v13  ;;  %v185_v20 = vrot.slane %v176_v14, %v184_v15 }
   0xa   :  { %205 = vmatmul.mubr.msk.bf16.vlgmr.msra.gmra.mxu0 %vm58_vm0, %v225_v9 }
   0xb   :  { %211 = vmatmul.mubr.msk.bf16.vlgmr.msra.gmra.mxu1 %vm58_vm0, %v226_v10 }
  0xca   :  { %v96_v17 = vpop.f32.mrf.mxu0 }
  0xcb   :  { %v167_v18 = vpop.f32.mrf.mxu1 }
  0xcc   :  { %v168_v19 = vadd.f32 %v167_v18, %v96_v17  ;;  %v98_v21 = vpop.f32.mrf.mxu0 }
  0xcd   :  { %v169_v22 = vpop.f32.mrf.mxu1 }
  0xce   :  { %v188_v23 = vadd.f32 %v181_v16, %v168_v19  ;;  %v170_v24 = vadd.f32 %v169_v22, %v98_v21  ;;  %v100_v25 = vpop.f32.mrf.mxu0 }
  0xcf   :  { %v171_v26 = vpop.f32.mrf.mxu1 }
  0xd0   :  { %192 = vst [vmem:[%s308_s5] sm:$0xff] %v188_v23  ;;  %v189_v27 = vadd.f32 %v185_v20, %v170_v24  ;;  %v172_v28 = vadd.f32 %v171_v26, %v100_v25  ;;  %v102_v29 = vpop.f32.mrf.mxu0 }
  0xd1   :  { %v173_v30 = vpop.f32.mrf.mxu1 }
  0xd2   :  { %193 = vst [vmem:[%s308_s5 + $0x8] sm:$0xff] %v189_v27  ;;  %v190_v31 = vadd.f32 %v181_v16, %v172_v28  ;;  %v174_v32 = vadd.f32 %v173_v30, %v102_v29 }
  0xd4   :  { %194 = vst [vmem:[%s308_s5 + $0x10] sm:$0xff] %v190_v31  ;;  %v191_v33 = vadd.f32 %v185_v20, %v174_v32 }
  0xd6   :  { %195 = vst [vmem:[%s308_s5 + $0x18] sm:$0xff] %v191_v33 }

// kernel: blstm_forward.9
= control target key start
LH: loop header
LB: loop body
LE: loop exit
PB: predicated region body
PF: predicated region fallthrough
CT: control target
= control target key end

     0   :  { %v218_v0 = vmov 0.0   ;;  %vm219_vm0 = vmmov 0   ;;  %vm53_vm1 = vcmask 261120   ;;  %vm172_vm2 = vcmask 130048   ;;  %s288_s3 = inlined_call_operand.vmem [shape: bf16[32,16], index: 3, kind: input, shape index: {}]   ;;  %s289_s2 = inlined_call_operand.vmem [shape: bf16[32,16], index: 2, kind: input, shape index: {}]   ;;  %s290_s1 = inlined_call_operand.vmem [shape: bf16[16,32], index: 1, kind: input, shape index: {}]   ;;  %s291_s0 = inlined_call_operand.vmem [shape: bf16[16,32], index: 0, kind: input, shape index: {}]   ;;  %s292_s4 = inlined_call_operand.vmem [shape: f32[1,16], index: 4, kind: input, shape index: {}]   ;;  %s293_s5 = inlined_call_operand.vmem [shape: f32[16,16], index: 5, kind: input, shape index: {}]   ;;  %s294_s6 = inlined_call_operand.vmem [shape: f32[16,16], index: 6, kind: output, shape index: {}]  }
   0x1   :  { %194 = vmatprep.subr.bf16.mxu0 %v218_v0  ;;  %202 = vmatprep.subr.bf16.mxu1 %v218_v0  ;;  %v212_v1 = vld [vmem:[%s288_s3 + $0x8] sm:$0xff]   ;;  %v214_v3 = vld [vmem:[%s288_s3] sm:$0xff]  }
   0x2   :  { %v213_v2 = vld [vmem:[%s289_s2 + $0x8] sm:$0xff]   ;;  %198 = vmatprep.mubr.msk.bf16.mxu0 %vm219_vm0, %v218_v0  ;;  %206 = vmatprep.mubr.msk.bf16.mxu1 %vm219_vm0, %v218_v0  ;;  %v215_v4 = vld [vmem:[%s289_s2] sm:$0xff]  }
   0x3   :  { %195 = vmatpush3.bf16.msra.mxu0 %v212_v1  ;;  %203 = vmatpush3.bf16.msra.mxu1 %v213_v2  ;;  %v216_v5 = vld [vmem:[%s290_s1] sm:$0xff]   ;;  %v169_v20 = vld [vmem:[%s293_s5 + $0x8] sm:$0xff] }
   0x4   :  { %196 = vmatprep.subr.bf16.mxu0 %v218_v0  ;;  %204 = vmatprep.subr.bf16.mxu1 %v218_v0  ;;  %v217_v6 = vld [vmem:[%s291_s0] sm:$0xff]  }
   0x5   :  { %v187_v9 = vld [vmem:[%s292_s4] ss:$0 sm:$0xff] }
   0x6   :  { %v168_v12 = vld [vmem:[%s293_s5] sm:$0xff] }
   0x7   :  { %197 = vmatpush3.bf16.msra.mxu0 %v214_v3  ;;  %205 = vmatpush3.bf16.msra.mxu1 %v215_v4 }
   0xa   :  { %199 = vmatmul.mubr.msk.bf16.vlgmr.msra.gmra.mxu0 %vm53_vm1, %v216_v5  ;;  %207 = vmatmul.mubr.msk.bf16.vlgmr.msra.gmra.mxu1 %vm53_vm1, %v217_v6 }
  0xca   :  { %v91_v7 = vpop.f32.mrf.mxu0  ;;  %v152_v8 = vpop.f32.mrf.mxu1 }
  0xcb   :  { %v153_v10 = vadd.f32 %v152_v8, %v91_v7 }
  0xcc   :  { %v200_v11 = vpop.f32.mrf.mxu0  ;;  %v208_v13 = vpop.f32.mrf.mxu1 }
  0xcd   :  { %v166_v14 = vadd.f32 %v187_v9, %v153_v10 }
  0xce   :  { %v94_v15 = vpop.f32.mrf.mxu0  ;;  %v155_v16 = vpop.f32.mrf.mxu1 }
  0xcf   :  { %v170_v17 = vadd.f32 %v168_v12, %v166_v14  ;;  %v156_v18 = vadd.f32 %v155_v16, %v94_v15 }
  0xd0   :  { %v201_v19 = vpop.f32.mrf.mxu0  ;;  %v209_v21 = vpop.f32.mrf.mxu1 }
  0xd1   :  { %173 = vst.msk [vmem:[%s294_s6] sm:$0xff] %vm172_vm2, %v170_v17  ;;  %v167_v22 = vadd.f32 %v187_v9, %v156_v18 }
  0xd3   :  { %v171_v23 = vadd.f32 %v169_v20, %v167_v22 }
  0xd5   :  { %174 = vst.msk [vmem:[%s294_s6 + $0x8] sm:$0xff] %vm172_vm2, %v171_v23 }

// kernel: blstm_forward.6
= control target key start
LH: loop header
LB: loop body
LE: loop exit
PB: predicated region body
PF: predicated region fallthrough
CT: control target
= control target key end

     0   :  { %vm183_vm0 = vcmask 254976   ;;  %v1668_v0 = vmov 0.0   ;;  %v1669_v4 = vmov 0   ;;  %s1670_s29 = smov 32   ;;  %vm204_vm1 = vcmask 261120   ;;  %s1671_s9 = smov 64   ;;  %s2192_s0 = inlined_call_operand.vmem [shape: f32[8,2,256], index: 0, kind: input, shape index: {}, may-alias: {0,1}]   ;;  %s2193_s1 = inlined_call_operand.vmem [shape: f32[8,2,256], index: 1, kind: input, shape index: {}, may-alias: {0,1}]   ;;  %s2194_s2 = inlined_call_operand.vmem [shape: bf16[64,256], index: 2, kind: input, shape index: {}]   ;;  %s2195_s3 = inlined_call_operand.vmem [shape: bf16[8,2,32], index: 3, kind: output, shape index: {0}]   ;;  %s2196_s4 = inlined_call_operand.vmem [shape: bf16[8,2,32], index: 4, kind: output, shape index: {1}]  }
   0x1   :  { %186 = vst.msk [vmem:[#allocation4] sm:$0x3] %vm183_vm0, %v1668_v0  ;;  %184 = vst.msk [vmem:[#allocation2] sm:$0x3] %vm183_vm0, %v1668_v0  ;;  %v1706_v1 = vld [vmem:[%s2194_s2 + $0x34] ss:$8 sps:$4 sm:$0xff]   ;;  %283 = vmatprep.mubr.bf16.mxu0 %v1669_v4  ;;  %438 = vmatprep.mubr.bf16.mxu1 %v1669_v4 }
   0x2   :  { %185 = vst.msk [vmem:[#allocation3] sm:$0x3] %vm183_vm0, %v1668_v0  ;;  %187 = vst.msk [vmem:[#allocation5] sm:$0x3] %vm183_vm0, %v1668_v0  ;;  %v1711_v2 = vld [vmem:[%s2194_s2 + $0x30] ss:$8 sps:$4 sm:$0xff]   ;;  %259 = vmatprep.subr.bf16.mxu0 %v1706_v1  ;;  %414 = vmatprep.subr.bf16.mxu1 %v1706_v1 }
   0x3   :  { %v1716_v3 = vld [vmem:[%s2194_s2 + $0x24] ss:$8 sps:$4 sm:$0xff]   ;;  %260 = vmatpush1.bf16.msra.mxu0 %v1711_v2  ;;  %v1724_v5 = vld [vmem:[%s2194_s2 + $0x20] ss:$8 sps:$4 sm:$0xff]   ;;  %v1731_v6 = vld [vmem:[%s2194_s2 + $0x14] ss:$8 sps:$4 sm:$0xff]   ;;  %415 = vmatpush1.bf16.msra.mxu1 %v1711_v2 }
   0x4   :  { %261 = vmatprep.subr.bf16.mxu0 %v1716_v3  ;;  %v28_v7 = vld [vmem:[%s2192_s0] sm:$0x3]  ;;  %416 = vmatprep.subr.bf16.mxu1 %v1716_v3  ;;  %v1743_v9 = vld [vmem:[%s2194_s2 + $0x10] ss:$8 sps:$4 sm:$0xff]   ;;  %v1750_v10 = vld [vmem:[%s2194_s2 + $0x4] ss:$8 sps:$4 sm:$0xff]  }
   0x5   :  { %29 = vst [vmem:[#allocation6] sm:$0x3] %v28_v7  ;;  %v1758_v11 = vld [vmem:[%s2194_s2] ss:$8 sps:$4 sm:$0xff]   ;;  %vm247_vm2 = vcmask 523264   ;;  %vm370_vm3 = vcmask 253952  }
   0x6   :  { %v1491_v16 = vld [vmem:[%s2193_s1 + $0x1e] sm:$0x3]  ;;  %v30_v53 = vld [vmem:[%s2192_s0 + $0x4] sm:$0x3]  ;;  %v1490_v62 = vld [vmem:[%s2193_s1 + $0x1a] sm:$0x3] }
   0x7   :  { %262 = vmatpush1.bf16.msra.mxu0 %v1724_v5  ;;  %417 = vmatpush1.bf16.msra.mxu1 %v1724_v5  ;;  %120 = vst [vmem:[#allocation7 + $0xe] sm:$0x3] %v1491_v16  ;;  %31 = vst [vmem:[#allocation6 + $0x2] sm:$0x3] %v30_v53 }
   0x8   :  { %v198_v8 = vld [vmem:[#allocation4] sm:$0x3]  ;;  %263 = vmatprep.subr.bf16.mxu0 %v1731_v6  ;;  %418 = vmatprep.subr.bf16.mxu1 %v1731_v6  ;;  %v196_v12 = vld [vmem:[#allocation2] sm:$0x3]  ;;  %118 = vst [vmem:[#allocation7 + $0xc] sm:$0x3] %v1490_v62 }
   0x9   :  { %201 = vrot.lane.b32.xlu0 %v198_v8, %s1670_s29  ;;  %v199_v27 = vld [vmem:[#allocation5] sm:$0x3]  ;;  %v197_v28 = vld [vmem:[#allocation3] sm:$0x3] }
   0xb   :  { %264 = vmatpush1.bf16.msra.mxu0 %v1743_v9  ;;  %419 = vmatpush1.bf16.msra.mxu1 %v1743_v9 }
   0xc   :  { %265 = vmatprep.subr.bf16.mxu0 %v1750_v10  ;;  %420 = vmatprep.subr.bf16.mxu1 %v1750_v10  ;;  %v292_v17 = vld [vmem:[#allocation6] sm:$0x3] }
   0xe   :  { %v295_v19 = vld [vmem:[#allocation7 + $0xe] sm:$0x3]  ;;  %v448_v63 = vld [vmem:[#allocation6 + $0x2] sm:$0x3] }
   0xf   :  { %266 = vmatpush1.bf16.msra.mxu0 %v1758_v11  ;;  %421 = vmatpush1.bf16.msra.mxu1 %v1758_v11  ;;  %v451_v7 = vld [vmem:[#allocation7 + $0xc] sm:$0x3] }
  0x10   :  { %562 = vmatprep.subr.bf16.mxu0 %v1706_v1  ;;  %710 = vmatprep.subr.bf16.mxu1 %v1706_v1 }
  0x7b   :  { %v202_v13 = vpop.permute.xlu0 %201 }
  0x7c   :  { %v205_v14 = vsel %vm204_vm1, %v196_v12, %v202_v13 }
  0x7d   :  { %v206_v15 = vpack.c.bf16 %v205_v14, %v205_v14 }
  0x7f   :  { %1500 = vmatmul.mubr.msk.bf16.vlgmr.msra.gmra.mxu0 %vm247_vm2, %v206_v15 }
  0x80   :  { %563 = vmatpush1.bf16.msra.mxu0 %v1711_v2  ;;  %586 = vmatprep.mubr.bf16.mxu0 %v1669_v4 }
  0x81   :  { %564 = vmatprep.subr.bf16.mxu0 %v1716_v3 }
  0x84   :  { %565 = vmatpush1.bf16.msra.mxu0 %v1724_v5 }
  0x85   :  { %566 = vmatprep.subr.bf16.mxu0 %v1731_v6 }
  0x88   :  { %567 = vmatpush1.bf16.msra.mxu0 %v1743_v9 }
  0x89   :  { %568 = vmatprep.subr.bf16.mxu0 %v1750_v10 }
  0x8c   :  { %569 = vmatpush1.bf16.msra.mxu0 %v1758_v11 }
  0x8d   :  { %858 = vmatprep.subr.bf16.mxu0 %v1706_v1 }
 0x13f   :  { %v285_v18 = vpop.f32.mrf.mxu0 }
 0x140   :  { %v293_v20 = vadd.f32 %v292_v17, %v285_v18 }
 0x141   :  { %v287_v21 = vpop.f32.mrf.mxu0 }
 0x142   :  { %1540 = vtanh.f32 %v293_v20  ;;  %v296_v22 = vadd.f32 %v295_v19, %v287_v21  ;;  %v297_v29 = vsub.f32 0.0, %v293_v20 }
 0x143   :  { %v289_v23 = vpop.f32.mrf.mxu0 }
 0x144   :  { %1542 = vtanh.f32 %v296_v22  ;;  %v324_v30 = vsub.f32 0.0, %v296_v22  ;;  %v298_v31 = vmul.f32 1.442695, %v297_v29 }
 0x145   :  { %v290_v24 = vpop.f32.mrf.mxu0 }
 0x146   :  { %v325_v32 = vmul.f32 1.442695, %v324_v30  ;;  %1544 = vpow2.f32 %v298_v31 }
 0x148   :  { %1546 = vpow2.f32 %v325_v32 }
 0x14f   :  { %v1541_v25 = vpop.eup %1540 }
 0x150   :  { %309 = vrot.lane.b32.xlu0 %v1541_v25, %s1671_s9 }
 0x151   :  { %v1543_v26 = vpop.eup %1542 }
 0x152   :  { %336 = vrot.lane.b32.xlu1 %v1543_v26, %s1671_s9 }
 0x153   :  { %v1545_v33 = vpop.eup %1544 }
 0x154   :  { %331 = vrot.lane.b32.xlu0 %v199_v27, %s1670_s29  ;;  %v300_v35 = vadd.f32 1.0, %v1545_v33 }
 0x155   :  { %v1547_v34 = vpop.eup %1546 }
 0x156   :  { %304 = vrot.lane.b32.xlu1 %v197_v28, %s1670_s29  ;;  %v327_v36 = vadd.f32 1.0, %v1547_v34  ;;  %1548 = vrcp.f32 %v300_v35 }
 0x158   :  { %1550 = vrcp.f32 %v327_v36 }
 0x163   :  { %v1549_v37 = vpop.eup %1548 }
 0x165   :  { %v1551_v40 = vpop.eup %1550 }
 0x1c2   :  { %v310_v38 = vpop.permute.xlu0 %309 }
 0x1c3   :  { %v312_v39 = vmul.f32 %v1549_v37, %v310_v38 }
 0x1c4   :  { %v337_v41 = vpop.permute.xlu1 %336 }
 0x1c5   :  { %v339_v42 = vmul.f32 %v1551_v40, %v337_v41  ;;  %314 = vrot.lane.b32.xlu1 %v312_v39, %s1670_s29 }
 0x1c6   :  { %v332_v44 = vpop.permute.xlu0 %331 }
 0x1c7   :  { %341 = vrot.lane.b32.xlu0 %v339_v42, %s1670_s29  ;;  %v334_v47 = vmul.f32 %v1551_v40, %v332_v44 }
 0x1c8   :  { %v305_v43 = vpop.permute.xlu1 %304 }
 0x1c9   :  { %v307_v45 = vmul.f32 %v1549_v37, %v305_v43 }
 0x237   :  { %v315_v46 = vpop.permute.xlu1 %314 }
 0x238   :  { %v1787_v48 = vadd.f32 %v315_v46, %v307_v45 }
 0x239   :  { %v342_v49 = vpop.permute.xlu0 %341 }
 0x23a   :  { %1552 = vtanh.f32 %v1787_v48  ;;  %v1790_v50 = vadd.f32 %v342_v49, %v334_v47  ;;  %v1489_v49 = vld [vmem:[%s2193_s1 + $0x16] sm:$0x3] }
 0x23b   :  { %116 = vst [vmem:[#allocation7 + $0xa] sm:$0x3] %v1489_v49 }
 0x23c   :  { %1554 = vtanh.f32 %v1790_v50 }
 0x247   :  { %v1553_v51 = vpop.eup %1552 }
 0x248   :  { %320 = vrot.lane.b32.xlu1 %v1553_v51, %s1671_s9 }
 0x249   :  { %v1555_v52 = vpop.eup %1554 }
 0x24a   :  { %347 = vrot.lane.b32.xlu0 %v1555_v52, %s1671_s9  ;;  %v599_v52 = vld [vmem:[#allocation7 + $0xa] sm:$0x3] }
 0x2ba   :  { %v321_v54 = vpop.permute.xlu1 %320 }
 0x2bb   :  { %v1798_v55 = vmul.f32 %v1549_v37, %v321_v54 }
 0x2bc   :  { %v348_v56 = vpop.permute.xlu0 %347 }
 0x2bd   :  { %v1800_v57 = vmul.f32 %v1551_v40, %v348_v56  ;;  %394 = vrot.lane.b32.xlu1 %v1798_v55, %s1670_s29  ;;  %v32_v40 = vld [vmem:[%s2192_s0 + $0x8] sm:$0x3] }
 0x2be   :  { %33 = vst [vmem:[#allocation6 + $0x4] sm:$0x3] %v32_v40 }
 0x2bf   :  { %398 = vrot.lane.b32.xlu0 %v1800_v57, %s1671_s9 }
 0x32f   :  { %v395_v58 = vpop.permute.xlu1 %394 }
 0x331   :  { %v399_v59 = vpop.permute.xlu0 %398 }
 0x332   :  { %v401_v60 = vsel %vm204_vm1, %v395_v58, %v399_v59 }
 0x333   :  { %v402_v61 = vpack.c.bf16 %v401_v60, %v401_v60 }
 0x335   :  { %1502 = vmatmul.mubr.msk.bf16.vlgmr.msra.gmra.mxu1 %vm247_vm2, %v402_v61 }
 0x336   :  { %711 = vmatpush1.bf16.msra.mxu1 %v1711_v2  ;;  %734 = vmatprep.mubr.bf16.mxu1 %v1669_v4 }
 0x337   :  { %712 = vmatprep.subr.bf16.mxu1 %v1716_v3 }
 0x33a   :  { %713 = vmatpush1.bf16.msra.mxu1 %v1724_v5 }
 0x33b   :  { %714 = vmatprep.subr.bf16.mxu1 %v1731_v6 }
 0x33e   :  { %715 = vmatpush1.bf16.msra.mxu1 %v1743_v9 }
 0x33f   :  { %716 = vmatprep.subr.bf16.mxu1 %v1750_v10 }
 0x342   :  { %717 = vmatpush1.bf16.msra.mxu1 %v1758_v11 }
 0x343   :  { %1006 = vmatprep.subr.bf16.mxu1 %v1706_v1 }
 0x3f5   :  { %v440_v0 = vpop.f32.mrf.mxu1 }
 0x3f6   :  { %v449_v8 = vadd.f32 %v448_v63, %v440_v0 }
 0x3f7   :  { %v442_v12 = vpop.f32.mrf.mxu1 }
 0x3f8   :  { %1556 = vtanh.f32 %v449_v8  ;;  %v452_v13 = vadd.f32 %v451_v7, %v442_v12  ;;  %v453_v18 = vsub.f32 0.0, %v449_v8 }
 0x3f9   :  { %v444_v14 = vpop.f32.mrf.mxu1 }
 0x3fa   :  { %1558 = vtanh.f32 %v452_v13  ;;  %v476_v19 = vsub.f32 0.0, %v452_v13  ;;  %v454_v20 = vmul.f32 1.442695, %v453_v18 }
 0x3fb   :  { %v445_v15 = vpop.f32.mrf.mxu1 }
 0x3fc   :  { %v477_v21 = vmul.f32 1.442695, %v476_v19  ;;  %1560 = vpow2.f32 %v454_v20 }
 0x3fe   :  { %1562 = vpow2.f32 %v477_v21 }
 0x405   :  { %v1557_v16 = vpop.eup %1556 }
 0x406   :  { %461 = vrot.lane.b32.xlu1 %v1557_v16, %s1671_s9 }
 0x407   :  { %v1559_v17 = vpop.eup %1558 }
 0x408   :  { %484 = vrot.lane.b32.xlu0 %v1559_v17, %s1671_s9 }
 0x409   :  { %v1561_v22 = vpop.eup %1560 }
 0x40a   :  { %v456_v24 = vadd.f32 1.0, %v1561_v22 }
 0x40b   :  { %v1563_v23 = vpop.eup %1562 }
 0x40c   :  { %v479_v25 = vadd.f32 1.0, %v1563_v23  ;;  %1564 = vrcp.f32 %v456_v24 }
 0x40e   :  { %1566 = vrcp.f32 %v479_v25 }
 0x419   :  { %v1565_v26 = vpop.eup %1564 }
 0x41a   :  { %v459_v32 = vmul.f32 %v1565_v26, %v1787_v48 }
 0x41b   :  { %v1567_v29 = vpop.eup %1566 }
 0x41c   :  { %v482_v35 = vmul.f32 %v1567_v29, %v1790_v50  ;;  %v596_v50 = vld [vmem:[#allocation6 + $0x4] sm:$0x3] }
 0x478   :  { %v462_v27 = vpop.permute.xlu1 %461 }
 0x479   :  { %v464_v28 = vmul.f32 %v1565_v26, %v462_v27 }
 0x47a   :  { %v485_v30 = vpop.permute.xlu0 %484 }
 0x47b   :  { %v487_v31 = vmul.f32 %v1567_v29, %v485_v30  ;;  %466 = vrot.lane.b32.xlu1 %v464_v28, %s1670_s29 }
 0x47d   :  { %489 = vrot.lane.b32.xlu0 %v487_v31, %s1670_s29 }
 0x4ed   :  { %v467_v33 = vpop.permute.xlu1 %466 }
 0x4ee   :  { %v1825_v34 = vadd.f32 %v467_v33, %v459_v32 }
 0x4ef   :  { %v490_v36 = vpop.permute.xlu0 %489 }
 0x4f0   :  { %1568 = vtanh.f32 %v1825_v34  ;;  %v1829_v37 = vadd.f32 %v490_v36, %v482_v35 }
 0x4f2   :  { %1570 = vtanh.f32 %v1829_v37 }
 0x4fd   :  { %v1569_v38 = vpop.eup %1568 }
 0x4fe   :  { %472 = vrot.lane.b32.xlu1 %v1569_v38, %s1671_s9  ;;  %v1488_v38 = vld [vmem:[%s2193_s1 + $0x12] sm:$0x3] }
 0x4ff   :  { %v1571_v39 = vpop.eup %1570  ;;  %114 = vst [vmem:[#allocation7 + $0x8] sm:$0x3] %v1488_v38 }
 0x500   :  { %495 = vrot.lane.b32.xlu0 %v1571_v39, %s1671_s9 }
 0x570   :  { %v473_v41 = vpop.permute.xlu1 %472 }
 0x571   :  { %v1837_v42 = vmul.f32 %v1565_v26, %v473_v41  ;;  %v747_v41 = vld [vmem:[#allocation7 + $0x8] sm:$0x3] }
 0x572   :  { %v496_v43 = vpop.permute.xlu0 %495 }
 0x573   :  { %v1839_v44 = vmul.f32 %v1567_v29, %v496_v43  ;;  %542 = vrot.lane.b32.xlu1 %v1837_v42, %s1670_s29  ;;  %v34_v29 = vld [vmem:[%s2192_s0 + $0xc] sm:$0x3] }
 0x574   :  { %35 = vst [vmem:[#allocation6 + $0x6] sm:$0x3] %v34_v29 }
 0x575   :  { %546 = vrot.lane.b32.xlu0 %v1839_v44, %s1671_s9 }
 0x57b   :  { %v744_v39 = vld [vmem:[#allocation6 + $0x6] sm:$0x3] }
 0x5e5   :  { %v543_v45 = vpop.permute.xlu1 %542 }
 0x5e7   :  { %v547_v46 = vpop.permute.xlu0 %546 }
 0x5e8   :  { %v549_v47 = vsel %vm204_vm1, %v543_v45, %v547_v46 }
 0x5e9   :  { %v550_v48 = vpack.c.bf16 %v549_v47, %v549_v47 }
 0x5eb   :  { %1505 = vmatmul.mubr.msk.bf16.vlgmr.msra.gmra.mxu0 %vm247_vm2, %v550_v48 }
 0x5ec   :  { %859 = vmatpush1.bf16.msra.mxu0 %v1711_v2  ;;  %882 = vmatprep.mubr.bf16.mxu0 %v1669_v4 }
 0x5ed   :  { %860 = vmatprep.subr.bf16.mxu0 %v1716_v3 }
 0x5f0   :  { %861 = vmatpush1.bf16.msra.mxu0 %v1724_v5 }
 0x5f1   :  { %862 = vmatprep.subr.bf16.mxu0 %v1731_v6 }
 0x5f4   :  { %863 = vmatpush1.bf16.msra.mxu0 %v1743_v9 }
 0x5f5   :  { %864 = vmatprep.subr.bf16.mxu0 %v1750_v10 }
 0x5f8   :  { %865 = vmatpush1.bf16.msra.mxu0 %v1758_v11 }
 0x5f9   :  { %1154 = vmatprep.subr.bf16.mxu0 %v1706_v1 }
 0x6ab   :  { %v588_v51 = vpop.f32.mrf.mxu0 }
 0x6ac   :  { %v597_v53 = vadd.f32 %v596_v50, %v588_v51 }
 0x6ad   :  { %v590_v54 = vpop.f32.mrf.mxu0 }
 0x6ae   :  { %1572 = vtanh.f32 %v597_v53  ;;  %v600_v56 = vadd.f32 %v599_v52, %v590_v54  ;;  %v601_v62 = vsub.f32 0.0, %v597_v53 }
 0x6af   :  { %v592_v58 = vpop.f32.mrf.mxu0 }
 0x6b0   :  { %1574 = vtanh.f32 %v600_v56  ;;  %v624_v63 = vsub.f32 0.0, %v600_v56  ;;  %v602_v0 = vmul.f32 1.442695, %v601_v62 }
 0x6b1   :  { %v593_v59 = vpop.f32.mrf.mxu0 }
 0x6b2   :  { %v625_v7 = vmul.f32 1.442695, %v624_v63  ;;  %1576 = vpow2.f32 %v602_v0 }
 0x6b4   :  { %1578 = vpow2.f32 %v625_v7 }
 0x6bb   :  { %v1573_v60 = vpop.eup %1572 }
 0x6bc   :  { %609 = vrot.lane.b32.xlu1 %v1573_v60, %s1671_s9 }
 0x6bd   :  { %v1575_v61 = vpop.eup %1574 }
 0x6be   :  { %632 = vrot.lane.b32.xlu0 %v1575_v61, %s1671_s9 }
 0x6bf   :  { %v1577_v8 = vpop.eup %1576 }
 0x6c0   :  { %v604_v13 = vadd.f32 1.0, %v1577_v8 }
 0x6c1   :  { %v1579_v12 = vpop.eup %1578 }
 0x6c2   :  { %v627_v14 = vadd.f32 1.0, %v1579_v12  ;;  %1580 = vrcp.f32 %v604_v13 }
 0x6c4   :  { %1582 = vrcp.f32 %v627_v14 }
 0x6cf   :  { %v1581_v15 = vpop.eup %1580 }
 0x6d0   :  { %v607_v21 = vmul.f32 %v1581_v15, %v1825_v34 }
 0x6d1   :  { %v1583_v18 = vpop.eup %1582 }
 0x6d2   :  { %v630_v24 = vmul.f32 %v1583_v18, %v1829_v37 }
 0x72e   :  { %v610_v16 = vpop.permute.xlu1 %609 }
 0x72f   :  { %v612_v17 = vmul.f32 %v1581_v15, %v610_v16 }
 0x730   :  { %v633_v19 = vpop.permute.xlu0 %632 }
 0x731   :  { %v635_v20 = vmul.f32 %v1583_v18, %v633_v19  ;;  %614 = vrot.lane.b32.xlu1 %v612_v17, %s1670_s29  ;;  %v36_v19 = vld [vmem:[%s2192_s0 + $0x10] sm:$0x3] }
 0x732   :  { %37 = vst [vmem:[#allocation6 + $0x8] sm:$0x3] %v36_v19 }
 0x733   :  { %637 = vrot.lane.b32.xlu0 %v635_v20, %s1670_s29 }
 0x739   :  { %v892_v29 = vld [vmem:[#allocation6 + $0x8] sm:$0x3] }
 0x7a3   :  { %v615_v22 = vpop.permute.xlu1 %614 }
 0x7a4   :  { %v1864_v23 = vadd.f32 %v615_v22, %v607_v21 }
 0x7a5   :  { %v638_v25 = vpop.permute.xlu0 %637 }
 0x7a6   :  { %1584 = vtanh.f32 %v1864_v23  ;;  %v1868_v26 = vadd.f32 %v638_v25, %v630_v24 }
 0x7a8   :  { %1586 = vtanh.f32 %v1868_v26 }
 0x7b3   :  { %v1585_v27 = vpop.eup %1584 }
 0x7b4   :  { %620 = vrot.lane.b32.xlu1 %v1585_v27, %s1671_s9 }
 0x7b5   :  { %v1587_v28 = vpop.eup %1586 }
 0x7b6   :  { %643 = vrot.lane.b32.xlu0 %v1587_v28, %s1671_s9  ;;  %v1487_v28 = vld [vmem:[%s2193_s1 + $0xe] sm:$0x3] }
 0x7b7   :  { %112 = vst [vmem:[#allocation7 + $0x6] sm:$0x3] %v1487_v28 }
 0x826   :  { %v621_v30 = vpop.permute.xlu1 %620 }
 0x827   :  { %v1876_v31 = vmul.f32 %v1581_v15, %v621_v30 }
 0x828   :  { %v644_v32 = vpop.permute.xlu0 %643 }
 0x829   :  { %v1878_v33 = vmul.f32 %v1583_v18, %v644_v32  ;;  %690 = vrot.lane.b32.xlu1 %v1876_v31, %s1670_s29  ;;  %v895_v32 = vld [vmem:[#allocation7 + $0x6] sm:$0x3] }
 0x82b   :  { %694 = vrot.lane.b32.xlu0 %v1878_v33, %s1671_s9 }
 0x89b   :  { %v691_v34 = vpop.permute.xlu1 %690 }
 0x89d   :  { %v695_v35 = vpop.permute.xlu0 %694 }
 0x89e   :  { %v697_v36 = vsel %vm204_vm1, %v691_v34, %v695_v35 }
 0x89f   :  { %v698_v37 = vpack.c.bf16 %v697_v36, %v697_v36 }
 0x8a1   :  { %1508 = vmatmul.mubr.msk.bf16.vlgmr.msra.gmra.mxu1 %vm247_vm2, %v698_v37 }
 0x8a2   :  { %1007 = vmatpush1.bf16.msra.mxu1 %v1711_v2  ;;  %1030 = vmatprep.mubr.bf16.mxu1 %v1669_v4 }
 0x8a3   :  { %1008 = vmatprep.subr.bf16.mxu1 %v1716_v3 }
 0x8a6   :  { %1009 = vmatpush1.bf16.msra.mxu1 %v1724_v5 }
 0x8a7   :  { %1010 = vmatprep.subr.bf16.mxu1 %v1731_v6 }
 0x8aa   :  { %1011 = vmatpush1.bf16.msra.mxu1 %v1743_v9 }
 0x8ab   :  { %1012 = vmatprep.subr.bf16.mxu1 %v1750_v10 }
 0x8ae   :  { %1013 = vmatpush1.bf16.msra.mxu1 %v1758_v11 }
 0x8af   :  { %1302 = vmatprep.subr.bf16.mxu1 %v1706_v1 }
 0x961   :  { %v736_v40 = vpop.f32.mrf.mxu1 }
 0x962   :  { %v745_v43 = vadd.f32 %v744_v39, %v736_v40 }
 0x963   :  { %v738_v45 = vpop.f32.mrf.mxu1 }
 0x964   :  { %1588 = vtanh.f32 %v745_v43  ;;  %v748_v46 = vadd.f32 %v747_v41, %v738_v45  ;;  %v749_v1 = vsub.f32 0.0, %v745_v43 }
 0x965   :  { %v740_v47 = vpop.f32.mrf.mxu1 }
 0x966   :  { %1590 = vtanh.f32 %v748_v46  ;;  %v772_v51 = vsub.f32 0.0, %v748_v46  ;;  %v750_v52 = vmul.f32 1.442695, %v749_v1 }
 0x967   :  { %v741_v48 = vpop.f32.mrf.mxu1 }
 0x968   :  { %v773_v53 = vmul.f32 1.442695, %v772_v51  ;;  %1592 = vpow2.f32 %v750_v52 }
 0x96a   :  { %1594 = vpow2.f32 %v773_v53 }
 0x971   :  { %v1589_v49 = vpop.eup %1588 }
 0x972   :  { %757 = vrot.lane.b32.xlu1 %v1589_v49, %s1671_s9 }
 0x973   :  { %v1591_v50 = vpop.eup %1590 }
 0x974   :  { %780 = vrot.lane.b32.xlu0 %v1591_v50, %s1671_s9 }
 0x975   :  { %v1593_v54 = vpop.eup %1592 }
 0x976   :  { %v752_v58 = vadd.f32 1.0, %v1593_v54 }
 0x977   :  { %v1595_v56 = vpop.eup %1594 }
 0x978   :  { %v775_v59 = vadd.f32 1.0, %v1595_v56  ;;  %1596 = vrcp.f32 %v752_v58 }
 0x97a   :  { %1598 = vrcp.f32 %v775_v59 }
 0x985   :  { %v1597_v60 = vpop.eup %1596 }
 0x986   :  { %v755_v8 = vmul.f32 %v1597_v60, %v1864_v23 }
 0x987   :  { %v1599_v63 = vpop.eup %1598 }
 0x988   :  { %v778_v14 = vmul.f32 %v1599_v63, %v1868_v26 }
 0x9e4   :  { %v758_v61 = vpop.permute.xlu1 %757 }
 0x9e5   :  { %v760_v62 = vmul.f32 %v1597_v60, %v758_v61 }
 0x9e6   :  { %v781_v0 = vpop.permute.xlu0 %780 }
 0x9e7   :  { %v783_v7 = vmul.f32 %v1599_v63, %v781_v0  ;;  %762 = vrot.lane.b32.xlu1 %v760_v62, %s1670_s29 }
 0x9e9   :  { %785 = vrot.lane.b32.xlu0 %v783_v7, %s1670_s29 }
 0xa59   :  { %v763_v12 = vpop.permute.xlu1 %762 }
 0xa5a   :  { %v1903_v13 = vadd.f32 %v763_v12, %v755_v8  ;;  %v38_v8 = vld [vmem:[%s2192_s0 + $0x14] sm:$0x3] }
 0xa5b   :  { %v786_v15 = vpop.permute.xlu0 %785  ;;  %39 = vst [vmem:[#allocation6 + $0xa] sm:$0x3] %v38_v8 }
 0xa5c   :  { %1600 = vtanh.f32 %v1903_v13  ;;  %v1907_v16 = vadd.f32 %v786_v15, %v778_v14 }
 0xa5e   :  { %1602 = vtanh.f32 %v1907_v16 }
 0xa69   :  { %v1601_v17 = vpop.eup %1600 }
 0xa6a   :  { %768 = vrot.lane.b32.xlu1 %v1601_v17, %s1671_s9 }
 0xa6b   :  { %v1603_v18 = vpop.eup %1602 }
 0xa6c   :  { %791 = vrot.lane.b32.xlu0 %v1603_v18, %s1671_s9 }
 0xadc   :  { %v769_v20 = vpop.permute.xlu1 %768 }
 0xadd   :  { %v1915_v21 = vmul.f32 %v1597_v60, %v769_v20  ;;  %v1486_v20 = vld [vmem:[%s2193_s1 + $0xa] sm:$0x3] }
 0xade   :  { %v792_v22 = vpop.permute.xlu0 %791  ;;  %110 = vst [vmem:[#allocation7 + $0x4] sm:$0x3] %v1486_v20 }
 0xadf   :  { %v1917_v23 = vmul.f32 %v1599_v63, %v792_v22  ;;  %838 = vrot.lane.b32.xlu1 %v1915_v21, %s1670_s29 }
 0xae1   :  { %842 = vrot.lane.b32.xlu0 %v1917_v23, %s1671_s9 }
 0xb51   :  { %v839_v24 = vpop.permute.xlu1 %838 }
 0xb53   :  { %v843_v25 = vpop.permute.xlu0 %842 }
 0xb54   :  { %v845_v26 = vsel %vm204_vm1, %v839_v24, %v843_v25 }
 0xb55   :  { %v846_v27 = vpack.c.bf16 %v845_v26, %v845_v26 }
 0xb57   :  { %1511 = vmatmul.mubr.msk.bf16.vlgmr.msra.gmra.mxu0 %vm247_vm2, %v846_v27 }
 0xb58   :  { %1155 = vmatpush1.bf16.msra.mxu0 %v1711_v2  ;;  %1178 = vmatprep.mubr.bf16.mxu0 %v1669_v4 }
 0xb59   :  { %1156 = vmatprep.subr.bf16.mxu0 %v1716_v3 }
 0xb5c   :  { %1157 = vmatpush1.bf16.msra.mxu0 %v1724_v5 }
 0xb5d   :  { %1158 = vmatprep.subr.bf16.mxu0 %v1731_v6 }
 0xb60   :  { %1159 = vmatpush1.bf16.msra.mxu0 %v1743_v9 }
 0xb61   :  { %1160 = vmatprep.subr.bf16.mxu0 %v1750_v10 }
 0xb64   :  { %1161 = vmatpush1.bf16.msra.mxu0 %v1758_v11 }
 0xc17   :  { %v884_v30 = vpop.f32.mrf.mxu0 }
 0xc18   :  { %v893_v34 = vadd.f32 %v892_v29, %v884_v30 }
 0xc19   :  { %v886_v35 = vpop.f32.mrf.mxu0 }
 0xc1a   :  { %1604 = vtanh.f32 %v893_v34  ;;  %v896_v36 = vadd.f32 %v895_v32, %v886_v35  ;;  %v897_v41 = vsub.f32 0.0, %v893_v34 }
 0xc1b   :  { %v888_v37 = vpop.f32.mrf.mxu0 }
 0xc1c   :  { %1606 = vtanh.f32 %v896_v36  ;;  %v920_v43 = vsub.f32 0.0, %v896_v36  ;;  %v898_v45 = vmul.f32 1.442695, %v897_v41 }
 0xc1d   :  { %v889_v38 = vpop.f32.mrf.mxu0 }
 0xc1e   :  { %v921_v46 = vmul.f32 1.442695, %v920_v43  ;;  %1608 = vpow2.f32 %v898_v45 }
 0xc20   :  { %1610 = vpow2.f32 %v921_v46 }
 0xc27   :  { %v1605_v39 = vpop.eup %1604 }
 0xc28   :  { %905 = vrot.lane.b32.xlu1 %v1605_v39, %s1671_s9 }
 0xc29   :  { %v1607_v40 = vpop.eup %1606 }
 0xc2a   :  { %928 = vrot.lane.b32.xlu0 %v1607_v40, %s1671_s9 }
 0xc2b   :  { %v1609_v47 = vpop.eup %1608 }
 0xc2c   :  { %v900_v49 = vadd.f32 1.0, %v1609_v47 }
 0xc2d   :  { %v1611_v48 = vpop.eup %1610 }
 0xc2e   :  { %v923_v50 = vadd.f32 1.0, %v1611_v48  ;;  %1612 = vrcp.f32 %v900_v49 }
 0xc30   :  { %1614 = vrcp.f32 %v923_v50 }
 0xc3b   :  { %v1613_v1 = vpop.eup %1612 }
 0xc3c   :  { %v903_v58 = vmul.f32 %v1613_v1, %v1903_v13 }
 0xc3d   :  { %v1615_v53 = vpop.eup %1614 }
 0xc3e   :  { %v926_v61 = vmul.f32 %v1615_v53, %v1907_v16 }
 0xc9a   :  { %v906_v51 = vpop.permute.xlu1 %905 }
 0xc9b   :  { %v908_v52 = vmul.f32 %v1613_v1, %v906_v51 }
 0xc9c   :  { %v929_v54 = vpop.permute.xlu0 %928 }
 0xc9d   :  { %v931_v56 = vmul.f32 %v1615_v53, %v929_v54  ;;  %910 = vrot.lane.b32.xlu1 %v908_v52, %s1670_s29 }
 0xc9f   :  { %933 = vrot.lane.b32.xlu0 %v931_v56, %s1670_s29 }
 0xd0f   :  { %v911_v59 = vpop.permute.xlu1 %910 }
 0xd10   :  { %v1941_v60 = vadd.f32 %v911_v59, %v903_v58 }
 0xd11   :  { %v934_v62 = vpop.permute.xlu0 %933 }
 0xd12   :  { %1616 = vtanh.f32 %v1941_v60  ;;  %v1945_v63 = vadd.f32 %v934_v62, %v926_v61  ;;  %v1485_v61 = vld [vmem:[%s2193_s1 + $0x6] sm:$0x3] }
 0xd13   :  { %108 = vst [vmem:[#allocation7 + $0x2] sm:$0x3] %v1485_v61 }
 0xd14   :  { %1618 = vtanh.f32 %v1945_v63 }
 0xd1f   :  { %v1617_v0 = vpop.eup %1616 }
 0xd20   :  { %916 = vrot.lane.b32.xlu1 %v1617_v0, %s1671_s9  ;;  %v1191_v0 = vld [vmem:[#allocation7 + $0x2] sm:$0x3] }
 0xd21   :  { %v1619_v7 = vpop.eup %1618 }
 0xd22   :  { %939 = vrot.lane.b32.xlu0 %v1619_v7, %s1671_s9 }
 0xd92   :  { %v917_v12 = vpop.permute.xlu1 %916 }
 0xd93   :  { %v1953_v13 = vmul.f32 %v1613_v1, %v917_v12  ;;  %v40_v1 = vld [vmem:[%s2192_s0 + $0x18] sm:$0x3] }
 0xd94   :  { %v940_v14 = vpop.permute.xlu0 %939  ;;  %41 = vst [vmem:[#allocation6 + $0xc] sm:$0x3] %v40_v1 }
 0xd95   :  { %v1955_v15 = vmul.f32 %v1615_v53, %v940_v14  ;;  %986 = vrot.lane.b32.xlu1 %v1953_v13, %s1670_s29 }
 0xd97   :  { %990 = vrot.lane.b32.xlu0 %v1955_v15, %s1671_s9 }
 0xd9b   :  { %v1188_v62 = vld [vmem:[#allocation6 + $0xc] sm:$0x3] }
 0xe07   :  { %v987_v16 = vpop.permute.xlu1 %986 }
 0xe09   :  { %v991_v17 = vpop.permute.xlu0 %990 }
 0xe0a   :  { %v993_v18 = vsel %vm204_vm1, %v987_v16, %v991_v17 }
 0xe0b   :  { %v994_v19 = vpack.c.bf16 %v993_v18, %v993_v18 }
 0xe0d   :  { %1514 = vmatmul.mubr.msk.bf16.vlgmr.msra.gmra.mxu1 %vm247_vm2, %v994_v19 }
 0xe0e   :  { %1303 = vmatpush1.bf16.msra.mxu1 %v1711_v2  ;;  %1326 = vmatprep.mubr.bf16.mxu1 %v1669_v4  ;;  %v1040_v2 = vld [vmem:[#allocation6 + $0xa] sm:$0x3]  ;;  %v1043_v4 = vld [vmem:[#allocation7 + $0x4] sm:$0x3] }
 0xe0f   :  { %1304 = vmatprep.subr.bf16.mxu1 %v1716_v3 }
 0xe12   :  { %1305 = vmatpush1.bf16.msra.mxu1 %v1724_v5 }
 0xe13   :  { %1306 = vmatprep.subr.bf16.mxu1 %v1731_v6 }
 0xe16   :  { %1307 = vmatpush1.bf16.msra.mxu1 %v1743_v9 }
 0xe17   :  { %1308 = vmatprep.subr.bf16.mxu1 %v1750_v10 }
 0xe1a   :  { %1309 = vmatpush1.bf16.msra.mxu1 %v1758_v11 }
 0xecd   :  { %v1032_v22 = vpop.f32.mrf.mxu1 }
 0xece   :  { %v1041_v24 = vadd.f32 %v1040_v2, %v1032_v22 }
 0xecf   :  { %v1034_v3 = vpop.f32.mrf.mxu1 }
 0xed0   :  { %1620 = vtanh.f32 %v1041_v24  ;;  %v1044_v5 = vadd.f32 %v1043_v4, %v1034_v3  ;;  %v1045_v11 = vsub.f32 0.0, %v1041_v24 }
 0xed1   :  { %v1036_v25 = vpop.f32.mrf.mxu1 }
 0xed2   :  { %1622 = vtanh.f32 %v1044_v5  ;;  %v1068_v26 = vsub.f32 0.0, %v1044_v5  ;;  %v1046_v27 = vmul.f32 1.442695, %v1045_v11 }
 0xed3   :  { %v1037_v6 = vpop.f32.mrf.mxu1 }
 0xed4   :  { %v1069_v28 = vmul.f32 1.442695, %v1068_v26  ;;  %1624 = vpow2.f32 %v1046_v27 }
 0xed6   :  { %1626 = vpow2.f32 %v1069_v28 }
 0xedd   :  { %v1621_v9 = vpop.eup %1620 }
 0xede   :  { %1053 = vrot.lane.b32.xlu1 %v1621_v9, %s1671_s9 }
 0xedf   :  { %v1623_v10 = vpop.eup %1622 }
 0xee0   :  { %1076 = vrot.lane.b32.xlu0 %v1623_v10, %s1671_s9 }
 0xee1   :  { %v1625_v29 = vpop.eup %1624 }
 0xee2   :  { %v1048_v32 = vadd.f32 1.0, %v1625_v29 }
 0xee3   :  { %v1627_v30 = vpop.eup %1626 }
 0xee4   :  { %v1071_v34 = vadd.f32 1.0, %v1627_v30  ;;  %1628 = vrcp.f32 %v1048_v32 }
 0xee6   :  { %1630 = vrcp.f32 %v1071_v34 }
 0xef1   :  { %v1629_v35 = vpop.eup %1628 }
 0xef2   :  { %v1051_v41 = vmul.f32 %v1629_v35, %v1941_v60 }
 0xef3   :  { %v1631_v38 = vpop.eup %1630 }
 0xef4   :  { %v1074_v46 = vmul.f32 %v1631_v38, %v1945_v63 }
 0xf50   :  { %v1054_v36 = vpop.permute.xlu1 %1053 }
 0xf51   :  { %v1056_v37 = vmul.f32 %v1629_v35, %v1054_v36 }
 0xf52   :  { %v1077_v39 = vpop.permute.xlu0 %1076 }
 0xf53   :  { %v1079_v40 = vmul.f32 %v1631_v38, %v1077_v39  ;;  %1058 = vrot.lane.b32.xlu1 %v1056_v37, %s1670_s29  ;;  %v42_v37 = vld [vmem:[%s2192_s0 + $0x1c] sm:$0x3] }
 0xf54   :  { %43 = vst [vmem:[#allocation6 + $0xe] sm:$0x3] %v42_v37  ;;  %v520_v37 = vpack.c.bf16 %v1839_v44, %v1839_v44 }
 0xf55   :  { %1081 = vrot.lane.b32.xlu0 %v1079_v40, %s1670_s29 }
 0xfc5   :  { %v1059_v43 = vpop.permute.xlu1 %1058 }
 0xfc6   :  { %v1061_v45 = vadd.f32 %v1059_v43, %v1051_v41 }
 0xfc7   :  { %v1082_v47 = vpop.permute.xlu0 %1081 }
 0xfc8   :  { %1632 = vtanh.f32 %v1061_v45  ;;  %v1084_v48 = vadd.f32 %v1082_v47, %v1074_v46 }
 0xfca   :  { %1634 = vtanh.f32 %v1084_v48 }
 0xfd5   :  { %v1633_v49 = vpop.eup %1632 }
 0xfd6   :  { %1064 = vrot.lane.b32.xlu1 %v1633_v49, %s1671_s9  ;;  %v1336_v49 = vld [vmem:[#allocation6 + $0xe] sm:$0x3] }
 0xfd7   :  { %v1635_v50 = vpop.eup %1634 }
 0xfd8   :  { %1087 = vrot.lane.b32.xlu0 %v1635_v50, %s1671_s9 }
0x1048   :  { %v1065_v51 = vpop.permute.xlu1 %1064 }
0x1049   :  { %v1985_v52 = vmul.f32 %v1629_v35, %v1065_v51 }
0x104a   :  { %v1088_v53 = vpop.permute.xlu0 %1087 }
0x104b   :  { %v1987_v54 = vmul.f32 %v1631_v38, %v1088_v53  ;;  %1134 = vrot.lane.b32.xlu1 %v1985_v52, %s1670_s29 }
0x104d   :  { %1138 = vrot.lane.b32.xlu0 %v1987_v54, %s1671_s9 }
0x10bd   :  { %v1135_v56 = vpop.permute.xlu1 %1134 }
0x10bf   :  { %v1139_v58 = vpop.permute.xlu0 %1138 }
0x10c0   :  { %v1141_v59 = vsel %vm204_vm1, %v1135_v56, %v1139_v58 }
0x10c1   :  { %v1142_v60 = vpack.c.bf16 %v1141_v59, %v1141_v59 }
0x10c3   :  { %1517 = vmatmul.mubr.msk.bf16.vlgmr.msra.gmra.mxu0 %vm247_vm2, %v1142_v60 }
0x1183   :  { %v1180_v63 = vpop.f32.mrf.mxu0 }
0x1184   :  { %v1189_v7 = vadd.f32 %v1188_v62, %v1180_v63 }
0x1185   :  { %v1182_v8 = vpop.f32.mrf.mxu0 }
0x1186   :  { %1636 = vtanh.f32 %v1189_v7  ;;  %v1192_v12 = vadd.f32 %v1191_v0, %v1182_v8  ;;  %v1193_v19 = vsub.f32 0.0, %v1189_v7 }
0x1187   :  { %v1184_v14 = vpop.f32.mrf.mxu0 }
0x1188   :  { %1638 = vtanh.f32 %v1192_v12  ;;  %v1216_v20 = vsub.f32 0.0, %v1192_v12  ;;  %v1194_v2 = vmul.f32 1.442695, %v1193_v19 }
0x1189   :  { %v1185_v16 = vpop.f32.mrf.mxu0 }
0x118a   :  { %v1217_v22 = vmul.f32 1.442695, %v1216_v20  ;;  %1640 = vpow2.f32 %v1194_v2 }
0x118c   :  { %1642 = vpow2.f32 %v1217_v22 }
0x1193   :  { %v1637_v17 = vpop.eup %1636 }
0x1194   :  { %1201 = vrot.lane.b32.xlu1 %v1637_v17, %s1671_s9 }
0x1195   :  { %v1639_v18 = vpop.eup %1638 }
0x1196   :  { %1224 = vrot.lane.b32.xlu0 %v1639_v18, %s1671_s9 }
0x1197   :  { %v1641_v4 = vpop.eup %1640 }
0x1198   :  { %v1196_v3 = vadd.f32 1.0, %v1641_v4 }
0x1199   :  { %v1643_v24 = vpop.eup %1642 }
0x119a   :  { %v1219_v5 = vadd.f32 1.0, %v1643_v24  ;;  %1644 = vrcp.f32 %v1196_v3 }
0x119c   :  { %1646 = vrcp.f32 %v1219_v5 }
0x11a7   :  { %v1645_v25 = vpop.eup %1644 }
0x11a8   :  { %v1199_v27 = vmul.f32 %v1645_v25, %v1061_v45 }
0x11a9   :  { %v1647_v10 = vpop.eup %1646 }
0x11aa   :  { %v1222_v30 = vmul.f32 %v1647_v10, %v1084_v48  ;;  %v1484_v48 = vld [vmem:[%s2193_s1 + $0x2] sm:$0x3]  ;;  %s1673_s1 = smov 96  }
0x11ab   :  { %106 = vst [vmem:[#allocation7] sm:$0x3] %v1484_v48  ;;  %v816_v48 = vpack.c.bf16 %v1917_v23, %v1917_v23 }
0x11b2   :  { %v1338_v1 = vld [vmem:[#allocation7] sm:$0x3] }
0x1206   :  { %v1202_v6 = vpop.permute.xlu1 %1201 }
0x1207   :  { %v1204_v9 = vmul.f32 %v1645_v25, %v1202_v6  ;;  %v1672_v6 = vmov 1966171168  }
0x1208   :  { %v1225_v11 = vpop.permute.xlu0 %1224 }
0x1209   :  { %v1227_v26 = vmul.f32 %v1647_v10, %v1225_v11  ;;  %1206 = vrot.lane.b32.xlu1 %v1204_v9, %s1670_s29  ;;  %v354_v9 = vunpack.c.l.s4 %v1672_v6 }
0x120b   :  { %1229 = vrot.lane.b32.xlu0 %v1227_v26, %s1670_s29  ;;  %v355_v26 = vunpack.c.0.s8 %v354_v9 }
0x127b   :  { %v1207_v28 = vpop.permute.xlu1 %1206 }
0x127c   :  { %v1209_v29 = vadd.f32 %v1207_v28, %v1199_v27 }
0x127d   :  { %v1230_v32 = vpop.permute.xlu0 %1229 }
0x127e   :  { %1648 = vtanh.f32 %v1209_v29  ;;  %v1232_v34 = vadd.f32 %v1230_v32, %v1222_v30  ;;  %v372_v30 = vpack.c.bf16 %v1800_v57, %v1800_v57 }
0x1280   :  { %1650 = vtanh.f32 %v1232_v34 }
0x128b   :  { %v1649_v35 = vpop.eup %1648 }
0x128c   :  { %1212 = vrot.lane.b32.xlu1 %v1649_v35, %s1671_s9 }
0x128d   :  { %v1651_v36 = vpop.eup %1650 }
0x128e   :  { %1235 = vrot.lane.b32.xlu0 %v1651_v36, %s1671_s9 }
0x12fe   :  { %v1213_v38 = vpop.permute.xlu1 %1212 }
0x12ff   :  { %v2007_v39 = vmul.f32 %v1645_v25, %v1213_v38 }
0x1300   :  { %v1236_v40 = vpop.permute.xlu0 %1235 }
0x1301   :  { %v2009_v41 = vmul.f32 %v1647_v10, %v1236_v40  ;;  %1282 = vrot.lane.b32.xlu1 %v2007_v39, %s1670_s29  ;;  %v356_v10 = vlaneseq }
0x1303   :  { %1286 = vrot.lane.b32.xlu0 %v2009_v41, %s1671_s9  ;;  %v357_v27 = vshrl.u32 %v356_v10, 7 }
0x1305   :  { %v2038_v28 = vsub.s32 %v355_v26, %v357_v27 }
0x1307   :  { %v380_v36 = vrot.slane %v372_v30, %v2038_v28 }
0x1309   :  { %v387_v44 = vrot.slane %v380_v36, %v2038_v28 }
0x1373   :  { %v1283_v43 = vpop.permute.xlu1 %1282 }
0x1375   :  { %v1287_v45 = vpop.permute.xlu0 %1286 }
0x1376   :  { %v1289_v46 = vsel %vm204_vm1, %v1283_v43, %v1287_v45  ;;  %v668_v43 = vpack.c.bf16 %v1878_v33, %v1878_v33 }
0x1377   :  { %v1290_v47 = vpack.c.bf16 %v1289_v46, %v1289_v46  ;;  %v795_v46 = vpack.c.bf16 %v1915_v21, %v1915_v21 }
0x1379   :  { %1520 = vmatmul.mubr.msk.bf16.vlgmr.msra.gmra.mxu1 %vm247_vm2, %v1290_v47  ;;  %v676_v47 = vrot.slane %v668_v43, %v2038_v28 }
0x137b   :  { %v683_v23 = vrot.slane %v676_v47, %v2038_v28 }
0x1439   :  { %v1328_v50 = vpop.f32.mrf.mxu1 }
0x143a   :  { %v1337_v51 = vadd.f32 %v1336_v49, %v1328_v50  ;;  %v803_v49 = vrot.slane %v795_v46, %v2038_v28  ;;  %v943_v50 = vpack.c.bf16 %v1953_v13, %v1953_v13 }
0x143b   :  { %v1330_v53 = vpop.f32.mrf.mxu1 }
0x143c   :  { %1652 = vtanh.f32 %v1337_v51  ;;  %v1339_v56 = vadd.f32 %v1338_v1, %v1330_v53  ;;  %v1340_v62 = vsub.f32 0.0, %v1337_v51  ;;  %v824_v1 = vrot.slane %v816_v48, %v2038_v28 }
0x143d   :  { %v1332_v58 = vpop.f32.mrf.mxu1  ;;  %v964_v51 = vpack.c.bf16 %v1955_v15, %v1955_v15  ;;  %v951_v53 = vrot.slane %v943_v50, %v2038_v28  ;;  %v810_v13 = vrot.slane %v803_v49, %v2038_v28 }
0x143e   :  { %1654 = vtanh.f32 %v1339_v56  ;;  %v1363_v63 = vsub.f32 0.0, %v1339_v56  ;;  %v1341_v0 = vmul.f32 1.442695, %v1340_v62  ;;  %v1091_v56 = vpack.c.bf16 %v1985_v52, %v1985_v52 }
0x143f   :  { %v1333_v59 = vpop.f32.mrf.mxu1  ;;  %v972_v58 = vrot.slane %v964_v51, %v2038_v28  ;;  %v831_v15 = vrot.slane %v824_v1, %v2038_v28  ;;  %v958_v52 = vrot.slane %v951_v53, %v2038_v28 }
0x1440   :  { %v1364_v7 = vmul.f32 1.442695, %v1363_v63  ;;  %1656 = vpow2.f32 %v1341_v0  ;;  %v1112_v59 = vpack.c.bf16 %v1987_v54, %v1987_v54  ;;  %v1260_v63 = vpack.c.bf16 %v2009_v41, %v2009_v41 }
0x1441   :  { %v979_v54 = vrot.slane %v972_v58, %v2038_v28 }
0x1442   :  { %1658 = vpow2.f32 %v1364_v7  ;;  %v1120_v62 = vrot.slane %v1112_v59, %v2038_v28 }
0x1449   :  { %v1653_v60 = vpop.eup %1652 }
0x144a   :  { %1348 = vrot.lane.b32.xlu1 %v1653_v60, %s1671_s9  ;;  %v1099_v60 = vrot.slane %v1091_v56, %v2038_v28 }
0x144b   :  { %v1655_v61 = vpop.eup %1654 }
0x144c   :  { %1371 = vrot.lane.b32.xlu0 %v1655_v61, %s1671_s9  ;;  %v1239_v61 = vpack.c.bf16 %v2007_v39, %v2007_v39  ;;  %v1106_v7 = vrot.slane %v1099_v60, %v2038_v28  ;;  %v1268_v39 = vrot.slane %v1260_v63, %v2038_v28 }
0x144d   :  { %v1657_v8 = vpop.eup %1656 }
0x144e   :  { %v1343_v14 = vadd.f32 1.0, %v1657_v8  ;;  %v1247_v0 = vrot.slane %v1239_v61, %v2038_v28  ;;  %v1127_v8 = vrot.slane %v1120_v62, %v2038_v28 }
0x144f   :  { %v1659_v12 = vpop.eup %1658 }
0x1450   :  { %v1366_v16 = vadd.f32 1.0, %v1659_v12  ;;  %1660 = vrcp.f32 %v1343_v14  ;;  %v1254_v41 = vrot.slane %v1247_v0, %v2038_v28  ;;  %v1275_v12 = vrot.slane %v1268_v39, %v2038_v28 }
0x1452   :  { %1662 = vrcp.f32 %v1366_v16 }
0x145d   :  { %v2022_v17 = vpop.eup %1660 }
0x145e   :  { %v1346_v4 = vmul.f32 %v2022_v17, %v1209_v29  ;;  %v351_v29 = vpack.c.bf16 %v1798_v55, %v1798_v55  ;;  %v647_v55 = vpack.c.bf16 %v1876_v31, %v1876_v31 }
0x145f   :  { %v2025_v20 = vpop.eup %1662 }
0x1460   :  { %v1369_v5 = vmul.f32 %v2025_v20, %v1232_v34  ;;  %v359_v32 = vrot.slane %v351_v29, %v2038_v28  ;;  %v499_v34 = vpack.c.bf16 %v1837_v42, %v1837_v42  ;;  %v528_v42 = vrot.slane %v520_v37, %v2038_v28 }
0x1461   :  { %v655_v45 = vrot.slane %v647_v55, %v2038_v28 }
0x1462   :  { %v507_v40 = vrot.slane %v499_v34, %v2038_v28  ;;  %v366_v57 = vrot.slane %v359_v32, %v2038_v28  ;;  %v535_v33 = vrot.slane %v528_v42, %v2038_v28 }
0x1463   :  { %v662_v21 = vrot.slane %v655_v45, %v2038_v28 }
0x1464   :  { %v514_v31 = vrot.slane %v507_v40, %v2038_v28 }
0x14bc   :  { %v1349_v18 = vpop.permute.xlu1 %1348 }
0x14bd   :  { %v1351_v19 = vmul.f32 %v2022_v17, %v1349_v18 }
0x14be   :  { %v1372_v2 = vpop.permute.xlu0 %1371 }
0x14bf   :  { %v1374_v22 = vmul.f32 %v2025_v20, %v1372_v2  ;;  %1353 = vrot.lane.b32.xlu1 %v1351_v19, %s1670_s29 }
0x14c1   :  { %1376 = vrot.lane.b32.xlu0 %v1374_v22, %s1670_s29 }
0x1531   :  { %v1354_v24 = vpop.permute.xlu1 %1353 }
0x1532   :  { %v2031_v3 = vadd.f32 %v1354_v24, %v1346_v4 }
0x1533   :  { %v1377_v25 = vpop.permute.xlu0 %1376 }
0x1534   :  { %1664 = vtanh.f32 %v2031_v3  ;;  %v2035_v11 = vadd.f32 %v1377_v25, %v1369_v5 }
0x1536   :  { %1666 = vtanh.f32 %v2035_v11 }
0x1541   :  { %v1665_v35 = vpop.eup %1664 }
0x1542   :  { %1359 = vrot.lane.b32.xlu1 %v1665_v35, %s1671_s9 }
0x1543   :  { %v1667_v38 = vpop.eup %1666 }
0x1544   :  { %1382 = vrot.lane.b32.xlu0 %v1667_v38, %s1671_s9 }
0x1546   :  { %367 = vrot.lane.b32.xlu1 %v366_v57, %s1670_s29 }
0x1548   :  { %388 = vrot.lane.b32.xlu0 %v387_v44, %s1670_s29 }
0x154a   :  { %515 = vrot.lane.b32.xlu1 %v514_v31, %s1670_s29 }
0x154c   :  { %536 = vrot.lane.b32.xlu0 %v535_v33, %s1670_s29 }
0x154e   :  { %663 = vrot.lane.b32.xlu1 %v662_v21, %s1670_s29 }
0x1550   :  { %684 = vrot.lane.b32.xlu0 %v683_v23, %s1670_s29 }
0x1552   :  { %811 = vrot.lane.b32.xlu1 %v810_v13, %s1670_s29 }
0x1554   :  { %832 = vrot.lane.b32.xlu0 %v831_v15, %s1670_s29 }
0x1556   :  { %959 = vrot.lane.b32.xlu1 %v958_v52, %s1670_s29 }
0x1558   :  { %980 = vrot.lane.b32.xlu0 %v979_v54, %s1670_s29 }
0x155a   :  { %1107 = vrot.lane.b32.xlu1 %v1106_v7, %s1670_s29 }
0x155c   :  { %1128 = vrot.lane.b32.xlu0 %v1127_v8, %s1670_s29 }
0x155e   :  { %1255 = vrot.lane.b32.xlu1 %v1254_v41, %s1670_s29 }
0x1560   :  { %1276 = vrot.lane.b32.xlu0 %v1275_v12, %s1670_s29 }
0x1564   :  { %1434 = vrot.lane.b32.xlu0 %v2031_v3, %s1673_s1 }
0x15b4   :  { %v1360_v14 = vpop.permute.xlu1 %1359 }
0x15b5   :  { %v1362_v16 = vmul.f32 %v2022_v17, %v1360_v14 }
0x15b6   :  { %v1383_v18 = vpop.permute.xlu0 %1382 }
0x15b7   :  { %v1386_v19 = vpack.c.bf16 %v1362_v16, %v1362_v16  ;;  %v1385_v2 = vmul.f32 %v2025_v20, %v1383_v18  ;;  %1428 = vrot.lane.b32.xlu1 %v1362_v16, %s1670_s29 }
0x15b8   :  { %v368_v22 = vpop.permute.xlu1 %367 }
0x15b9   :  { %v1394_v4 = vrot.slane %v1386_v19, %v2038_v28  ;;  %v1407_v24 = vpack.c.bf16 %v1385_v2, %v1385_v2  ;;  %371 = vst.msk [vmem:[%s2195_s3] sm:$0x1] %vm370_vm3, %v368_v22 }
0x15ba   :  { %v389_v3 = vpop.permute.xlu0 %388 }
0x15bb   :  { %v1415_v5 = vrot.slane %v1407_v24, %v2038_v28  ;;  %1501 = vst.msk [vmem:[%s2196_s4 + $0x7] sm:$0x1] %vm370_vm3, %v389_v3  ;;  %v1401_v17 = vrot.slane %v1394_v4, %v2038_v28 }
0x15bc   :  { %v516_v20 = vpop.permute.xlu1 %515 }
0x15bd   :  { %1503 = vst.msk [vmem:[%s2195_s3 + $0x1] sm:$0x1] %vm370_vm3, %v516_v20  ;;  %1402 = vrot.lane.b32.xlu1 %v1401_v17, %s1670_s29  ;;  %v1422_v25 = vrot.slane %v1415_v5, %v2038_v28 }
0x15be   :  { %v537_v6 = vpop.permute.xlu0 %536 }
0x15bf   :  { %1504 = vst.msk [vmem:[%s2196_s4 + $0x6] sm:$0x1] %vm370_vm3, %v537_v6  ;;  %1423 = vrot.lane.b32.xlu0 %v1422_v25, %s1670_s29 }
0x15c0   :  { %v664_v9 = vpop.permute.xlu1 %663 }
0x15c1   :  { %1506 = vst.msk [vmem:[%s2195_s3 + $0x2] sm:$0x1] %vm370_vm3, %v664_v9  ;;  %1439 = vrot.lane.b32.xlu1 %v1385_v2, %s1670_s29 }
0x15c2   :  { %v685_v10 = vpop.permute.xlu0 %684 }
0x15c3   :  { %1507 = vst.msk [vmem:[%s2196_s4 + $0x5] sm:$0x1] %vm370_vm3, %v685_v10  ;;  %1444 = vrot.lane.b32.xlu0 %v2035_v11, %s1673_s1 }
0x15c4   :  { %v812_v26 = vpop.permute.xlu1 %811 }
0x15c5   :  { %1509 = vst.msk [vmem:[%s2195_s3 + $0x3] sm:$0x1] %vm370_vm3, %v812_v26 }
0x15c6   :  { %v833_v27 = vpop.permute.xlu0 %832 }
0x15c7   :  { %1510 = vst.msk [vmem:[%s2196_s4 + $0x4] sm:$0x1] %vm370_vm3, %v833_v27 }
0x15c8   :  { %v960_v28 = vpop.permute.xlu1 %959 }
0x15c9   :  { %1512 = vst.msk [vmem:[%s2195_s3 + $0x4] sm:$0x1] %vm370_vm3, %v960_v28 }
0x15ca   :  { %v981_v29 = vpop.permute.xlu0 %980 }
0x15cb   :  { %1513 = vst.msk [vmem:[%s2196_s4 + $0x3] sm:$0x1] %vm370_vm3, %v981_v29 }
0x15cc   :  { %v1108_v11 = vpop.permute.xlu1 %1107 }
0x15cd   :  { %1515 = vst.msk [vmem:[%s2195_s3 + $0x5] sm:$0x1] %vm370_vm3, %v1108_v11 }
0x15ce   :  { %v1129_v30 = vpop.permute.xlu0 %1128 }
0x15cf   :  { %1516 = vst.msk [vmem:[%s2196_s4 + $0x2] sm:$0x1] %vm370_vm3, %v1129_v30 }
0x15d0   :  { %v1256_v32 = vpop.permute.xlu1 %1255 }
0x15d1   :  { %1518 = vst.msk [vmem:[%s2195_s3 + $0x6] sm:$0x1] %vm370_vm3, %v1256_v32 }
0x15d2   :  { %v1277_v34 = vpop.permute.xlu0 %1276 }
0x15d3   :  { %1519 = vst.msk [vmem:[%s2196_s4 + $0x1] sm:$0x1] %vm370_vm3, %v1277_v34 }
0x15d6   :  { %v1435_v35 = vpop.permute.xlu0 %1434 }
0x15d7   :  { %1437 = vst.msk [vmem:[#allocation3] sm:$0x3] %vm183_vm0, %v1435_v35 }
0x1629   :  { %v1429_v36 = vpop.permute.xlu1 %1428 }
0x162a   :  { %1432 = vst.msk [vmem:[#allocation2] sm:$0x3] %vm183_vm0, %v1429_v36 }
0x162f   :  { %v1403_v37 = vpop.permute.xlu1 %1402 }
0x1630   :  { %1521 = vst.msk [vmem:[%s2195_s3 + $0x7] sm:$0x1] %vm370_vm3, %v1403_v37 }
0x1631   :  { %v1424_v38 = vpop.permute.xlu0 %1423 }
0x1632   :  { %1426 = vst.msk [vmem:[%s2196_s4] sm:$0x1] %vm370_vm3, %v1424_v38 }
0x1633   :  { %v1440_v40 = vpop.permute.xlu1 %1439 }
0x1634   :  { %1442 = vst.msk [vmem:[#allocation4] sm:$0x3] %vm183_vm0, %v1440_v40 }
0x1635   :  { %v1445_v55 = vpop.permute.xlu0 %1444 }
0x1636   :  { %1447 = vst.msk [vmem:[#allocation5] sm:$0x3] %vm183_vm0, %v1445_v55 }

</bundles_post_ra>
